<compile_context>
chip_gen: v5e
topology: v5e:2x2
jax: 0.10.0
libtpu: 0.0.40
codegen_flags: <defaults>
</compile_context>

<pallas_src>
import jax
import jax.numpy as jnp
from jax.experimental import pallas as pl
from jax.experimental.pallas import tpu as pltpu

LANE = 128  # TPU lane width; only the hidden dim is padded to this.


def _round_up(n, m):
    return pl.cdiv(n, m) * m


def _pad2d(a, shape):
    """Zero-pad a 2-D array up to `shape` (exact for this MLP)."""
    return jnp.pad(a, [(0, t - s) for s, t in zip(a.shape, shape)])


def _megacore_tc_count():
    """How many TensorCores can pick up `parallel` grid tiles on this chip."""
    try:
        kind = jax.devices()[0].device_kind.lower()
    except Exception:
        return 1
    # v7x (and v4/v5p megacore) have 2 TCs/chip; v5e/v6e have 1, where a
    # single grid step minimizes per-step pipeline overhead.
    for tag in ("7x", "v7", "v4", "v5p", "v5 p"):
        if tag in kind:
            return 2
    return 1


def prepare_pnet_params(w1, b1, w2, b2, *, compute_dtype=jnp.bfloat16):
    """One-time prep: lane-pad the hidden dim and cast weights to bf16.

    Weights are stored (in, out) so the kernel does x @ W.  Zero padding of
    the hidden dim is numerically exact: padded hidden columns see bias 0,
    relu(0) = 0, and multiply all-zero padded rows of w2.
    """
    d_in, hidden = w1.shape
    d_out = w2.shape[1]
    h_p = _round_up(hidden, LANE)

    w1_p = _pad2d(w1, (d_in, h_p)).astype(compute_dtype)
    b1_p = _pad2d(b1.reshape(1, -1), (1, h_p)).astype(jnp.float32)
    w2_p = _pad2d(w2, (h_p, d_out)).astype(compute_dtype)
    b2_p = b2.reshape(1, -1).astype(jnp.float32)
    return w1_p, b1_p, w2_p, b2_p


def _make_pnet_kernel(compute_dtype):
    def pnet_kernel(x_ref, w1_ref, b1_ref, w2_ref, b2_ref, o_ref):
        # x:  (TB, D_in)          -- unpadded last dim
        # w1: (D_in, H_p) bf16    b1: (1, H_p) f32
        # w2: (H_p, D_out) bf16   b2: (1, D_out) f32
        x = x_ref[...].astype(compute_dtype)
        # MXU matmuls with f32 accumulation; bias + ReLU stay f32 on the VPU.
        h = jnp.dot(x, w1_ref[...], preferred_element_type=jnp.float32)
        h = jnp.maximum(h + b1_ref[...], 0.0)
        y = jnp.dot(h.astype(compute_dtype), w2_ref[...],
                    preferred_element_type=jnp.float32)
        o_ref[...] = (y + b2_ref[...]).astype(o_ref.dtype)

    return pnet_kernel


def pnet_forward(x, w1_p, b1_p, w2_p, b2_p, *, block_b=4096, num_tiles=None,
                 compute_dtype=jnp.bfloat16):
    """y = relu(x @ w1 + b1) @ w2 + b2, with params from prepare_pnet_params."""
    B, d_in = x.shape
    h_p = w1_p.shape[1]
    d_out = w2_p.shape[1]

    if num_tiles is None:
        num_tiles = _megacore_tc_count()

    # Batch tile: enough tiles to feed every TensorCore, each a multiple of 8
    # sublanes, capped by block_b (VMEM headroom on v7x for huge batches).
    tb = _round_up(pl.cdiv(B, num_tiles), 8)
    tb = min(tb, _round_up(block_b, 8))
    b_p = _round_up(B, tb)

    # Only pad the batch (rows), and only when B is not a tile multiple.
    x_p = x if b_p == B else jnp.pad(x, ((0, b_p - B), (0, 0)))

    out_p = pl.pallas_call(
        _make_pnet_kernel(compute_dtype),
        out_shape=jax.ShapeDtypeStruct((b_p, d_out), x.dtype),
        grid=(b_p // tb,),
        in_specs=[
            # Batch-tiled activations; last dim = full array dim (legal, no pad).
            pl.BlockSpec((tb, d_in), lambda i: (i, 0)),
            # Weights / biases resident in VMEM across all grid steps.
            pl.BlockSpec((d_in, h_p), lambda i: (0, 0)),
            pl.BlockSpec((1, h_p), lambda i: (0, 0)),
            pl.BlockSpec((h_p, d_out), lambda i: (0, 0)),
            pl.BlockSpec((1, d_out), lambda i: (0, 0)),
        ],
        # Unpadded output block: full-extent last dim, 8x fewer writeback bytes.
        out_specs=pl.BlockSpec((tb, d_out), lambda i: (i, 0)),
        compiler_params=pltpu.CompilerParams(
            dimension_semantics=("parallel",),  # shards batch tiles across TCs
        ),
    )(x_p, w1_p, b1_p, w2_p, b2_p)

    return out_p if b_p == B else out_p[:B]


def pnet_reference(x, w1, b1, w2, b2, compute_dtype=jnp.bfloat16):
    """Pure-JAX reference with the same bf16-matmul / f32-accumulate recipe."""
    h = jnp.dot(x.astype(compute_dtype), w1.astype(compute_dtype),
                preferred_element_type=jnp.float32) + b1
    h = jnp.maximum(h, 0.0)
    y = jnp.dot(h.astype(compute_dtype), w2.astype(compute_dtype),
                preferred_element_type=jnp.float32) + b2
    return y


def init_pnet_params(key, input_dim, num_params, dtype=jnp.float32):
    """Deterministic init mimicking nn.Linear default (uniform +-1/sqrt(fan_in))."""
    hidden = (input_dim + num_params) // 2
    k1, k2, k3, k4 = jax.random.split(key, 4)

    bound1 = 1.0 / jnp.sqrt(input_dim)
    # stored as (in, out) so the kernel does x @ W
    w1 = jax.random.uniform(k1, (input_dim, hidden), dtype, -bound1, bound1)
    b1 = jax.random.uniform(k2, (1, hidden), dtype, -bound1, bound1)

    bound2 = 1.0 / jnp.sqrt(hidden)
    w2 = jax.random.uniform(k3, (hidden, num_params), dtype, -bound2, bound2)
    b2 = jax.random.uniform(k4, (1, num_params), dtype, -bound2, bound2)
    return w1, b1, w2, b2


if __name__ == "__main__":
    # PNet feature sizes stay small (they come from the model); the batch is
    # made large enough to amortize per-call overhead and (on 2-TC chips) to
    # exercise two "parallel" batch tiles.
    batch = 1024
    input_dim = 32
    num_params = 16

    key = jax.random.PRNGKey(0)
    kx, kp = jax.random.split(key)

    x = jax.random.normal(kx, (batch, input_dim), dtype=jnp.float32)
    w1, b1, w2, b2 = init_pnet_params(kp, input_dim, num_params)

    # One-time parameter prep (pad hidden dim, cast weights to bf16).
    params = prepare_pnet_params(w1, b1, w2, b2)

    out = pnet_forward(x, *params)
    out = jax.block_until_ready(out)

    # Reference with identical bf16-matmul recipe (should match tightly) ...
    ref_bf16 = pnet_reference(x, w1, b1, w2, b2)
    # ... and full-f32 reference as a sanity bound on the bf16 error.
    ref_f32 = jnp.maximum(x @ w1 + b1, 0.0) @ w2 + b2

    assert out.shape == (batch, num_params)
    assert jnp.allclose(out, ref_bf16, atol=2e-3, rtol=2e-3)
    assert jnp.allclose(out, ref_f32, atol=5e-2, rtol=5e-2)

    print("KERNEL_OK")
</pallas_src>

<mosaic_0001>
module attributes {stable_mosaic.version = 11 : i64} {
  func.func @pnet_kernel(%arg0: i32, %arg1: memref<1024x32xf32, #tpu.memory_space<vmem>>, %arg2: memref<32x128xbf16, #tpu.memory_space<vmem>>, %arg3: memref<1x128xf32, #tpu.memory_space<vmem>>, %arg4: memref<128x16xbf16, #tpu.memory_space<vmem>>, %arg5: memref<1x16xf32, #tpu.memory_space<vmem>>, %arg6: memref<1024x16xf32, #tpu.memory_space<vmem>>) attributes {dimension_semantics = [#tpu.dimension_semantics<parallel>], iteration_bounds = array<i64: 1>, scalar_prefetch = 0 : i64, scratch_operands = 0 : i64, tpu.core_type = #tpu.core_type<tc>, window_params = [{transform_indices = @transform_0, window_bounds = array<i64: 1024, 32>}, {pipeline_mode = #tpu.pipeline_mode<synchronous>, transform_indices = @transform_1, window_bounds = array<i64: 32, 128>}, {pipeline_mode = #tpu.pipeline_mode<synchronous>, transform_indices = @transform_2, window_bounds = array<i64: 1, 128>}, {pipeline_mode = #tpu.pipeline_mode<synchronous>, transform_indices = @transform_3, window_bounds = array<i64: 128, 16>}, {pipeline_mode = #tpu.pipeline_mode<synchronous>, transform_indices = @transform_4, window_bounds = array<i64: 1, 16>}, {transform_indices = @transform_5, window_bounds = array<i64: 1024, 16>}]} {
    %c0 = arith.constant 0 : index
    %c0_0 = arith.constant 0 : index
    %0 = vector.load %arg1[%c0, %c0_0] : memref<1024x32xf32, #tpu.memory_space<vmem>>, vector<1024x32xf32>
    %1 = arith.truncf %0 : vector<1024x32xf32> to vector<1024x32xbf16>
    %c0_1 = arith.constant 0 : index
    %c0_2 = arith.constant 0 : index
    %2 = vector.load %arg2[%c0_1, %c0_2] : memref<32x128xbf16, #tpu.memory_space<vmem>>, vector<32x128xbf16>
    %cst = arith.constant dense<0.000000e+00> : vector<1024x128xf32>
    %3 = tpu.matmul %1, %2, %cst {dimension_numbers = #tpu.dot_dimension_numbers<[1], [0], [0], [1], [0, 0, 1, 1], [], []>} : vector<1024x32xbf16>, vector<32x128xbf16>, vector<1024x128xf32> -> vector<1024x128xf32>
    %c0_3 = arith.constant 0 : index
    %c0_4 = arith.constant 0 : index
    %4 = vector.load %arg3[%c0_3, %c0_4] : memref<1x128xf32, #tpu.memory_space<vmem>>, vector<1x128xf32>
    %5 = vector.broadcast %4 : vector<1x128xf32> to vector<1024x128xf32>
    %6 = arith.addf %3, %5 : vector<1024x128xf32>
    %cst_5 = arith.constant 0.000000e+00 : f32
    %7 = vector.broadcast %cst_5 : f32 to vector<1024x128xf32>
    %8 = arith.maximumf %6, %7 : vector<1024x128xf32>
    %9 = arith.truncf %8 : vector<1024x128xf32> to vector<1024x128xbf16>
    %c0_6 = arith.constant 0 : index
    %c0_7 = arith.constant 0 : index
    %10 = vector.load %arg4[%c0_6, %c0_7] : memref<128x16xbf16, #tpu.memory_space<vmem>>, vector<128x16xbf16>
    %cst_8 = arith.constant dense<0.000000e+00> : vector<1024x16xf32>
    %11 = tpu.matmul %9, %10, %cst_8 {dimension_numbers = #tpu.dot_dimension_numbers<[1], [0], [0], [1], [0, 0, 1, 1], [], []>} : vector<1024x128xbf16>, vector<128x16xbf16>, vector<1024x16xf32> -> vector<1024x16xf32>
    %c0_9 = arith.constant 0 : index
    %c0_10 = arith.constant 0 : index
    %12 = vector.load %arg5[%c0_9, %c0_10] : memref<1x16xf32, #tpu.memory_space<vmem>>, vector<1x16xf32>
    %13 = vector.broadcast %12 : vector<1x16xf32> to vector<1024x16xf32>
    %14 = arith.addf %11, %13 : vector<1024x16xf32>
    %c0_11 = arith.constant 0 : index
    %c0_12 = arith.constant 0 : index
    %15 = vector.load %arg6[%c0_11, %c0_12] : memref<1024x16xf32, #tpu.memory_space<vmem>>, vector<1024x16xf32>
    tpu.vector_store %arg6[%c0_11, %c0_12], %14 {strides = array<i32>} : memref<1024x16xf32, #tpu.memory_space<vmem>>, vector<1024x16xf32>,
    return
  }
  func.func @transform_0(%arg0: i32) -> (i32, i32) {
    %c0_i32 = arith.constant 0 : i32
    %c0_i32_0 = arith.constant 0 : i32
    return %arg0, %c0_i32 : i32, i32
  }
  func.func @transform_1(%arg0: i32) -> (i32, i32) {
    %c0_i32 = arith.constant 0 : i32
    %c0_i32_0 = arith.constant 0 : i32
    %c0_i32_1 = arith.constant 0 : i32
    return %c0_i32, %c0_i32_0 : i32, i32
  }
  func.func @transform_2(%arg0: i32) -> (i32, i32) {
    %c0_i32 = arith.constant 0 : i32
    %c0_i32_0 = arith.constant 0 : i32
    %c0_i32_1 = arith.constant 0 : i32
    return %c0_i32, %c0_i32_0 : i32, i32
  }
  func.func @transform_3(%arg0: i32) -> (i32, i32) {
    %c0_i32 = arith.constant 0 : i32
    %c0_i32_0 = arith.constant 0 : i32
    %c0_i32_1 = arith.constant 0 : i32
    return %c0_i32, %c0_i32_0 : i32, i32
  }
  func.func @transform_4(%arg0: i32) -> (i32, i32) {
    %c0_i32 = arith.constant 0 : i32
    %c0_i32_0 = arith.constant 0 : i32
    %c0_i32_1 = arith.constant 0 : i32
    return %c0_i32, %c0_i32_0 : i32, i32
  }
  func.func @transform_5(%arg0: i32) -> (i32, i32) {
    %c0_i32 = arith.constant 0 : i32
    %c0_i32_0 = arith.constant 0 : i32
    return %arg0, %c0_i32 : i32, i32
  }
}

</mosaic_0001>

<bundles_post_ra>
// kernel: tpu_custom_call.1
= control target key start
LH: loop header
LB: loop body
LE: loop exit
PB: predicated region body
PF: predicated region fallthrough
CT: control target
= control target key end

     0   :  { %vm233_vm0 = vcmask 261120   ;;  %vm1344_vm1 = vcmask 130048   ;;  %s2899_s1 = inlined_call_operand.vmem [shape: bf16[32,128], index: 1, kind: input, shape index: {}]   ;;  %s2900_s0 = inlined_call_operand.vmem [shape: f32[1024,32], index: 0, kind: input, shape index: {}]   ;;  %s2901_s2 = inlined_call_operand.vmem [shape: f32[1,128], index: 2, kind: input, shape index: {}]   ;;  %s2902_s3 = inlined_call_operand.vmem [shape: bf16[128,16], index: 3, kind: input, shape index: {}]   ;;  %s2903_s4 = inlined_call_operand.vmem [shape: f32[1,16], index: 4, kind: input, shape index: {}]   ;;  %s2904_s5 = inlined_call_operand.vmem [shape: f32[1024,16], index: 5, kind: output, shape index: {}]  }
   0x1   :  { %v1582_v0 = vld [vmem:[%s2899_s1 + $0x8] sm:$0xff]  ;;  %v1581_v1 = vld [vmem:[%s2899_s1] sm:$0xff]  ;;  %v23_v5 = vld [vmem:[%s2900_s0 + $0x10] sm:$0xff] }
   0x2   :  { %432 = vmatpush.bf16.msra.mxu0 %v1582_v0  ;;  %v21_v2 = vld [vmem:[%s2900_s0] sm:$0xff]  ;;  %v22_v3 = vld [vmem:[%s2900_s0 + $0x8] sm:$0xff]  ;;  %1591 = vmatpush.bf16.msra.mxu3 %v1582_v0  ;;  %v24_v6 = vld [vmem:[%s2900_s0 + $0x18] sm:$0xff] }
   0x3   :  { %v149_v4 = vpack.c.bf16 %v22_v3, %v21_v2  ;;  %v150_v7 = vpack.c.bf16 %v24_v6, %v23_v5  ;;  %v25_v8 = vld [vmem:[%s2900_s0 + $0x20] sm:$0xff]  ;;  %v26_v9 = vld [vmem:[%s2900_s0 + $0x28] sm:$0xff]  ;;  %v27_v11 = vld [vmem:[%s2900_s0 + $0x30] sm:$0xff] }
   0x4   :  { %v151_v10 = vpack.c.bf16 %v26_v9, %v25_v8  ;;  %v28_v12 = vld [vmem:[%s2900_s0 + $0x38] sm:$0xff]  ;;  %v29_v14 = vld [vmem:[%s2900_s0 + $0x40] sm:$0xff]  ;;  %v30_v15 = vld [vmem:[%s2900_s0 + $0x48] sm:$0xff] }
   0x5   :  { %v152_v13 = vpack.c.bf16 %v28_v12, %v27_v11  ;;  %v153_v16 = vpack.c.bf16 %v30_v15, %v29_v14  ;;  %v1590_v17 = vld [vmem:[%s2902_s3 + $0x38] sm:$0xff]  ;;  %v31_v18 = vld [vmem:[%s2900_s0 + $0x50] sm:$0xff]  ;;  %v1588_v22 = vld [vmem:[%s2902_s3 + $0x28] sm:$0xff] }
   0x6   :  { %433 = vmatpush.bf16.msra.mxu0 %v1581_v1  ;;  %1592 = vmatpush.bf16.msra.mxu3 %v1581_v1  ;;  %v32_v19 = vld [vmem:[%s2900_s0 + $0x58] sm:$0xff]  ;;  %v1589_v21 = vld [vmem:[%s2902_s3 + $0x30] sm:$0xff]  ;;  %v1587_v23 = vld [vmem:[%s2902_s3 + $0x20] sm:$0xff] }
   0x7   :  { %1015 = vmatpush.bf16.msra.mxu1 %v1590_v17  ;;  %1593 = vmatpush.bf16.msra.mxu2 %v1590_v17  ;;  %v154_v20 = vpack.c.bf16 %v32_v19, %v31_v18  ;;  %v33_v24 = vld [vmem:[%s2900_s0 + $0x60] sm:$0xff]  ;;  %v34_v25 = vld [vmem:[%s2900_s0 + $0x68] sm:$0xff]  ;;  %v1586_v26 = vld [vmem:[%s2902_s3 + $0x18] sm:$0xff] }
   0x8   :  { %v155_v27 = vpack.c.bf16 %v34_v25, %v33_v24  ;;  %v1585_v28 = vld [vmem:[%s2902_s3 + $0x10] sm:$0xff]  ;;  %v1584_v29 = vld [vmem:[%s2902_s3 + $0x8] sm:$0xff]  ;;  %v1583_v30 = vld [vmem:[%s2902_s3] sm:$0xff] }
   0x9   :  { %1485 = vmatmul.msk.bf16.vlgmr.msra.gmra.mxu0 %vm233_vm0, %v149_v4  ;;  %v35_v31 = vld [vmem:[%s2900_s0 + $0x70] sm:$0xff]  ;;  %v36_v32 = vld [vmem:[%s2900_s0 + $0x78] sm:$0xff]  ;;  %v37_v34 = vld [vmem:[%s2900_s0 + $0x80] sm:$0xff] }
   0xa   :  { %v156_v33 = vpack.c.bf16 %v36_v32, %v35_v31  ;;  %v38_v35 = vld [vmem:[%s2900_s0 + $0x88] sm:$0xff]  ;;  %v1731_v38 = vld [vmem:[%s2901_s2] ss:$0 sm:$0xff]  ;;  %v39_v44 = vld [vmem:[%s2900_s0 + $0x90] sm:$0xff] }
   0xb   :  { %1016 = vmatpush.bf16.msra.mxu1 %v1589_v21  ;;  %1594 = vmatpush.bf16.msra.mxu2 %v1589_v21  ;;  %v157_v36 = vpack.c.bf16 %v38_v35, %v37_v34  ;;  %v40_v45 = vld [vmem:[%s2900_s0 + $0x98] sm:$0xff]  ;;  %v41_v54 = vld [vmem:[%s2900_s0 + $0xa0] sm:$0xff]  ;;  %v42_v55 = vld [vmem:[%s2900_s0 + $0xa8] sm:$0xff] }
   0xc   :  { %v158_v47 = vpack.c.bf16 %v40_v45, %v39_v44  ;;  %v159_v57 = vpack.c.bf16 %v42_v55, %v41_v54  ;;  %v43_v0 = vld [vmem:[%s2900_s0 + $0xb0] sm:$0xff]  ;;  %v44_v1 = vld [vmem:[%s2900_s0 + $0xb8] sm:$0xff]  ;;  %v46_v11 = vld [vmem:[%s2900_s0 + $0xc8] sm:$0xff] }
   0xd   :  { %v160_v3 = vpack.c.bf16 %v44_v1, %v43_v0  ;;  %v48_v21 = vld [vmem:[%s2900_s0 + $0xd8] sm:$0xff]  ;;  %v50_v31 = vld [vmem:[%s2900_s0 + $0xe8] sm:$0xff] }
   0xe   :  { %v56_v0 = vld [vmem:[%s2900_s0 + $0x118] sm:$0xff] }
   0xf   :  { %1017 = vmatpush.bf16.msra.mxu1 %v1588_v22  ;;  %1595 = vmatpush.bf16.msra.mxu2 %v1588_v22 }
  0x13   :  { %1018 = vmatpush.bf16.msra.mxu1 %v1587_v23  ;;  %1596 = vmatpush.bf16.msra.mxu2 %v1587_v23 }
  0x17   :  { %1019 = vmatpush.bf16.msra.mxu1 %v1586_v26  ;;  %1597 = vmatpush.bf16.msra.mxu2 %v1586_v26 }
  0x19   :  { %1486 = vmatmul.msk.bf16.gmra.mxu0 %vm233_vm0, %v150_v7 }
  0x1b   :  { %1020 = vmatpush.bf16.msra.mxu1 %v1585_v28  ;;  %1598 = vmatpush.bf16.msra.mxu2 %v1585_v28 }
  0x1f   :  { %1021 = vmatpush.bf16.msra.mxu1 %v1584_v29  ;;  %1599 = vmatpush.bf16.msra.mxu2 %v1584_v29 }
  0x23   :  { %1022 = vmatpush.bf16.msra.mxu1 %v1583_v30  ;;  %1600 = vmatpush.bf16.msra.mxu2 %v1583_v30  ;;  %v49_v30 = vld [vmem:[%s2900_s0 + $0xe0] sm:$0xff] }
  0x29   :  { %1487 = vmatmul.msk.bf16.gmra.mxu0 %vm233_vm0, %v151_v10  ;;  %v45_v10 = vld [vmem:[%s2900_s0 + $0xc0] sm:$0xff] }
  0x39   :  { %1488 = vmatmul.msk.bf16.gmra.mxu0 %vm233_vm0, %v152_v13  ;;  %v161_v13 = vpack.c.bf16 %v46_v11, %v45_v10 }
  0x49   :  { %1489 = vmatmul.msk.bf16.gmra.mxu0 %vm233_vm0, %v153_v16 }
  0x59   :  { %1490 = vmatmul.msk.bf16.gmra.mxu0 %vm233_vm0, %v154_v20  ;;  %v47_v20 = vld [vmem:[%s2900_s0 + $0xd0] sm:$0xff] }
  0x5a   :  { %v162_v23 = vpack.c.bf16 %v48_v21, %v47_v20 }
  0x69   :  { %1491 = vmatmul.msk.bf16.gmra.mxu0 %vm233_vm0, %v155_v27 }
  0x79   :  { %1492 = vmatmul.msk.bf16.gmra.mxu0 %vm233_vm0, %v156_v33  ;;  %v163_v33 = vpack.c.bf16 %v50_v31, %v49_v30 }
  0x86   :  { %v435_v37 = vpop.f32.mrf.mxu0 }
  0x87   :  { %v436_v39 = vadd.f32 %v1731_v38, %v435_v37 }
  0x89   :  { %1493 = vmatmul.msk.bf16.gmra.mxu0 %vm233_vm0, %v157_v36  ;;  %v755_v42 = vmax.f32 %v436_v39, 0.0 }
  0x8e   :  { %v437_v40 = vpop.f32.mrf.mxu0 }
  0x8f   :  { %v438_v41 = vadd.f32 %v1731_v38, %v437_v40 }
  0x91   :  { %v756_v43 = vmax.f32 %v438_v41, 0.0  ;;  %v51_v41 = vld [vmem:[%s2900_s0 + $0xf0] sm:$0xff] }
  0x93   :  { %v883_v46 = vpack.c.bf16 %v756_v43, %v755_v42  ;;  %v52_v42 = vld [vmem:[%s2900_s0 + $0xf8] sm:$0xff] }
  0x94   :  { %v164_v44 = vpack.c.bf16 %v52_v42, %v51_v41  ;;  %v61_v42 = vld [vmem:[%s2900_s0 + $0x140] sm:$0xff] }
  0x95   :  { %1023 = vmatmul.bf16.vlgmr.msra.gmra.mxu1 %v883_v46 }
  0x96   :  { %v440_v48 = vpop.f32.mrf.mxu0 }
  0x97   :  { %v441_v49 = vadd.f32 %v1731_v38, %v440_v48 }
  0x99   :  { %1494 = vmatmul.msk.bf16.gmra.mxu0 %vm233_vm0, %v158_v47  ;;  %v757_v52 = vmax.f32 %v441_v49, 0.0 }
  0x9e   :  { %v442_v50 = vpop.f32.mrf.mxu0 }
  0x9f   :  { %v443_v51 = vadd.f32 %v1731_v38, %v442_v50 }
  0xa1   :  { %v758_v53 = vmax.f32 %v443_v51, 0.0  ;;  %v53_v51 = vld [vmem:[%s2900_s0 + $0x100] sm:$0xff] }
  0xa3   :  { %v884_v56 = vpack.c.bf16 %v758_v53, %v757_v52  ;;  %v54_v52 = vld [vmem:[%s2900_s0 + $0x108] sm:$0xff] }
  0xa4   :  { %v165_v54 = vpack.c.bf16 %v54_v52, %v53_v51 }
  0xa5   :  { %1028 = vmatmul.bf16.gmra.mxu1 %v884_v56 }
  0xa6   :  { %v445_v58 = vpop.f32.mrf.mxu0 }
  0xa7   :  { %v446_v59 = vadd.f32 %v1731_v38, %v445_v58 }
  0xa9   :  { %1495 = vmatmul.msk.bf16.gmra.mxu0 %vm233_vm0, %v159_v57  ;;  %v759_v62 = vmax.f32 %v446_v59, 0.0  ;;  %v1811_v59 = vld [vmem:[%s2903_s4] ss:$0 sm:$0xff] }
  0xae   :  { %v447_v60 = vpop.f32.mrf.mxu0 }
  0xaf   :  { %v448_v61 = vadd.f32 %v1731_v38, %v447_v60 }
  0xb1   :  { %v760_v63 = vmax.f32 %v448_v61, 0.0 }
  0xb3   :  { %v885_v2 = vpack.c.bf16 %v760_v63, %v759_v62  ;;  %v55_v63 = vld [vmem:[%s2900_s0 + $0x110] sm:$0xff] }
  0xb5   :  { %1033 = vmatmul.bf16.gmra.mxu1 %v885_v2 }
  0xb6   :  { %v450_v4 = vpop.f32.mrf.mxu0 }
  0xb7   :  { %v451_v5 = vadd.f32 %v1731_v38, %v450_v4 }
  0xb9   :  { %1496 = vmatmul.msk.bf16.gmra.mxu0 %vm233_vm0, %v160_v3  ;;  %v761_v8 = vmax.f32 %v451_v5, 0.0  ;;  %v166_v3 = vpack.c.bf16 %v56_v0, %v55_v63 }
  0xbe   :  { %v452_v6 = vpop.f32.mrf.mxu0 }
  0xbf   :  { %v453_v7 = vadd.f32 %v1731_v38, %v452_v6 }
  0xc1   :  { %v762_v9 = vmax.f32 %v453_v7, 0.0 }
  0xc3   :  { %v886_v12 = vpack.c.bf16 %v762_v9, %v761_v8 }
  0xc5   :  { %1038 = vmatmul.bf16.gmra.mxu1 %v886_v12 }
  0xc6   :  { %v455_v14 = vpop.f32.mrf.mxu0 }
  0xc7   :  { %v456_v15 = vadd.f32 %v1731_v38, %v455_v14  ;;  %v58_v14 = vld [vmem:[%s2900_s0 + $0x128] sm:$0xff] }
  0xc9   :  { %1497 = vmatmul.msk.bf16.gmra.mxu0 %vm233_vm0, %v161_v13  ;;  %v763_v18 = vmax.f32 %v456_v15, 0.0  ;;  %v57_v13 = vld [vmem:[%s2900_s0 + $0x120] sm:$0xff] }
  0xce   :  { %v457_v16 = vpop.f32.mrf.mxu0 }
  0xcf   :  { %v458_v17 = vadd.f32 %v1731_v38, %v457_v16 }
  0xd1   :  { %v764_v19 = vmax.f32 %v458_v17, 0.0  ;;  %v167_v17 = vpack.c.bf16 %v58_v14, %v57_v13 }
  0xd3   :  { %v887_v22 = vpack.c.bf16 %v764_v19, %v763_v18 }
  0xd5   :  { %1043 = vmatmul.bf16.gmra.mxu1 %v887_v22 }
  0xd6   :  { %v460_v24 = vpop.f32.mrf.mxu0 }
  0xd7   :  { %v461_v25 = vadd.f32 %v1731_v38, %v460_v24 }
  0xd9   :  { %1498 = vmatmul.msk.bf16.gmra.mxu0 %vm233_vm0, %v162_v23  ;;  %v765_v28 = vmax.f32 %v461_v25, 0.0 }
  0xde   :  { %v462_v26 = vpop.f32.mrf.mxu0 }
  0xdf   :  { %v463_v27 = vadd.f32 %v1731_v38, %v462_v26 }
  0xe1   :  { %v766_v29 = vmax.f32 %v463_v27, 0.0  ;;  %v59_v27 = vld [vmem:[%s2900_s0 + $0x130] sm:$0xff] }
  0xe3   :  { %v888_v32 = vpack.c.bf16 %v766_v29, %v765_v28  ;;  %v60_v28 = vld [vmem:[%s2900_s0 + $0x138] sm:$0xff] }
  0xe4   :  { %v168_v31 = vpack.c.bf16 %v60_v28, %v59_v27 }
  0xe5   :  { %1048 = vmatmul.bf16.gmra.mxu1 %v888_v32 }
  0xe6   :  { %v465_v34 = vpop.f32.mrf.mxu0 }
  0xe7   :  { %v466_v35 = vadd.f32 %v1731_v38, %v465_v34 }
  0xe9   :  { %1499 = vmatmul.msk.bf16.gmra.mxu0 %vm233_vm0, %v163_v33  ;;  %v767_v39 = vmax.f32 %v466_v35, 0.0 }
  0xee   :  { %v467_v36 = vpop.f32.mrf.mxu0 }
  0xef   :  { %v468_v37 = vadd.f32 %v1731_v38, %v467_v36 }
  0xf1   :  { %v768_v40 = vmax.f32 %v468_v37, 0.0 }
  0xf3   :  { %v889_v43 = vpack.c.bf16 %v768_v40, %v767_v39 }
  0xf5   :  { %1053 = vmatmul.bf16.gmra.mxu1 %v889_v43  ;;  %v62_v43 = vld [vmem:[%s2900_s0 + $0x148] sm:$0xff] }
  0xf6   :  { %v470_v45 = vpop.f32.mrf.mxu0 }
  0xf7   :  { %v471_v46 = vadd.f32 %v1731_v38, %v470_v45 }
  0xf9   :  { %1500 = vmatmul.msk.bf16.gmra.mxu0 %vm233_vm0, %v164_v44  ;;  %v769_v49 = vmax.f32 %v471_v46, 0.0  ;;  %v169_v46 = vpack.c.bf16 %v62_v43, %v61_v42 }
  0xfe   :  { %v472_v47 = vpop.f32.mrf.mxu0 }
  0xff   :  { %v473_v48 = vadd.f32 %v1731_v38, %v472_v47 }
 0x101   :  { %v770_v50 = vmax.f32 %v473_v48, 0.0 }
 0x103   :  { %v890_v53 = vpack.c.bf16 %v770_v50, %v769_v49 }
 0x105   :  { %1058 = vmatmul.bf16.gmra.mxu1 %v890_v53 }
 0x106   :  { %v475_v55 = vpop.f32.mrf.mxu0 }
 0x107   :  { %v476_v56 = vadd.f32 %v1731_v38, %v475_v55 }
 0x109   :  { %1501 = vmatmul.msk.bf16.gmra.mxu0 %vm233_vm0, %v165_v54  ;;  %v771_v60 = vmax.f32 %v476_v56, 0.0  ;;  %v63_v56 = vld [vmem:[%s2900_s0 + $0x150] sm:$0xff] }
 0x10e   :  { %v477_v57 = vpop.f32.mrf.mxu0 }
 0x10f   :  { %v478_v58 = vadd.f32 %v1731_v38, %v477_v57  ;;  %v64_v57 = vld [vmem:[%s2900_s0 + $0x158] sm:$0xff] }
 0x111   :  { %v772_v61 = vmax.f32 %v478_v58, 0.0 }
 0x112   :  { %v1024_v62 = vpop.f32.mrf.mxu1 }
 0x113   :  { %v1025_v1 = vadd.f32 %v1811_v59, %v1024_v62  ;;  %v891_v2 = vpack.c.bf16 %v772_v61, %v771_v60  ;;  %v170_v61 = vpack.c.bf16 %v64_v57, %v63_v56 }
 0x115   :  { %1345 = vst.msk [vmem:[%s2904_s5] sm:$0xff] %vm1344_vm1, %v1025_v1  ;;  %1063 = vmatmul.bf16.gmra.mxu1 %v891_v2 }
 0x116   :  { %v480_v4 = vpop.f32.mrf.mxu0 }
 0x117   :  { %v481_v7 = vadd.f32 %v1731_v38, %v480_v4 }
 0x119   :  { %1502 = vmatmul.msk.bf16.gmra.mxu0 %vm233_vm0, %v166_v3  ;;  %v773_v10 = vmax.f32 %v481_v7, 0.0  ;;  %v65_v7 = vld [vmem:[%s2900_s0 + $0x160] sm:$0xff] }
 0x11a   :  { %v1026_v5 = vpop.f32.mrf.mxu1 }
 0x11b   :  { %v1027_v6 = vadd.f32 %v1811_v59, %v1026_v5 }
 0x11d   :  { %1346 = vst.msk [vmem:[%s2904_s5 + $0x8] sm:$0xff] %vm1344_vm1, %v1027_v6 }
 0x11e   :  { %v482_v8 = vpop.f32.mrf.mxu0 }
 0x11f   :  { %v483_v9 = vadd.f32 %v1731_v38, %v482_v8  ;;  %v66_v8 = vld [vmem:[%s2900_s0 + $0x168] sm:$0xff] }
 0x121   :  { %v774_v11 = vmax.f32 %v483_v9, 0.0 }
 0x122   :  { %v1029_v12 = vpop.f32.mrf.mxu1 }
 0x123   :  { %v1030_v15 = vadd.f32 %v1811_v59, %v1029_v12  ;;  %v892_v16 = vpack.c.bf16 %v774_v11, %v773_v10  ;;  %v171_v11 = vpack.c.bf16 %v66_v8, %v65_v7 }
 0x125   :  { %1347 = vst.msk [vmem:[%s2904_s5 + $0x10] sm:$0xff] %vm1344_vm1, %v1030_v15  ;;  %1068 = vmatmul.bf16.gmra.mxu1 %v892_v16 }
 0x126   :  { %v485_v18 = vpop.f32.mrf.mxu0 }
 0x127   :  { %v486_v21 = vadd.f32 %v1731_v38, %v485_v18 }
 0x129   :  { %1503 = vmatmul.msk.bf16.gmra.mxu0 %vm233_vm0, %v167_v17  ;;  %v775_v24 = vmax.f32 %v486_v21, 0.0  ;;  %v67_v21 = vld [vmem:[%s2900_s0 + $0x170] sm:$0xff] }
 0x12a   :  { %v1031_v19 = vpop.f32.mrf.mxu1 }
 0x12b   :  { %v1032_v20 = vadd.f32 %v1811_v59, %v1031_v19 }
 0x12d   :  { %1348 = vst.msk [vmem:[%s2904_s5 + $0x18] sm:$0xff] %vm1344_vm1, %v1032_v20 }
 0x12e   :  { %v487_v22 = vpop.f32.mrf.mxu0 }
 0x12f   :  { %v488_v23 = vadd.f32 %v1731_v38, %v487_v22  ;;  %v68_v22 = vld [vmem:[%s2900_s0 + $0x178] sm:$0xff] }
 0x131   :  { %v776_v25 = vmax.f32 %v488_v23, 0.0 }
 0x132   :  { %v1034_v26 = vpop.f32.mrf.mxu1 }
 0x133   :  { %v1035_v29 = vadd.f32 %v1811_v59, %v1034_v26  ;;  %v893_v30 = vpack.c.bf16 %v776_v25, %v775_v24  ;;  %v172_v25 = vpack.c.bf16 %v68_v22, %v67_v21 }
 0x135   :  { %1349 = vst.msk [vmem:[%s2904_s5 + $0x20] sm:$0xff] %vm1344_vm1, %v1035_v29  ;;  %1073 = vmatmul.bf16.gmra.mxu1 %v893_v30 }
 0x136   :  { %v490_v32 = vpop.f32.mrf.mxu0 }
 0x137   :  { %v491_v35 = vadd.f32 %v1731_v38, %v490_v32 }
 0x139   :  { %1504 = vmatmul.msk.bf16.gmra.mxu0 %vm233_vm0, %v168_v31  ;;  %v777_v39 = vmax.f32 %v491_v35, 0.0  ;;  %v69_v35 = vld [vmem:[%s2900_s0 + $0x180] sm:$0xff] }
 0x13a   :  { %v1036_v33 = vpop.f32.mrf.mxu1 }
 0x13b   :  { %v1037_v34 = vadd.f32 %v1811_v59, %v1036_v33 }
 0x13d   :  { %1350 = vst.msk [vmem:[%s2904_s5 + $0x28] sm:$0xff] %vm1344_vm1, %v1037_v34 }
 0x13e   :  { %v492_v36 = vpop.f32.mrf.mxu0 }
 0x13f   :  { %v493_v37 = vadd.f32 %v1731_v38, %v492_v36  ;;  %v70_v36 = vld [vmem:[%s2900_s0 + $0x188] sm:$0xff] }
 0x141   :  { %v778_v40 = vmax.f32 %v493_v37, 0.0 }
 0x142   :  { %v1039_v41 = vpop.f32.mrf.mxu1 }
 0x143   :  { %v1040_v44 = vadd.f32 %v1811_v59, %v1039_v41  ;;  %v894_v45 = vpack.c.bf16 %v778_v40, %v777_v39  ;;  %v173_v40 = vpack.c.bf16 %v70_v36, %v69_v35 }
 0x145   :  { %1351 = vst.msk [vmem:[%s2904_s5 + $0x30] sm:$0xff] %vm1344_vm1, %v1040_v44  ;;  %1078 = vmatmul.bf16.gmra.mxu1 %v894_v45 }
 0x146   :  { %v495_v47 = vpop.f32.mrf.mxu0 }
 0x147   :  { %v496_v50 = vadd.f32 %v1731_v38, %v495_v47 }
 0x149   :  { %1505 = vmatmul.msk.bf16.gmra.mxu0 %vm233_vm0, %v169_v46  ;;  %v779_v53 = vmax.f32 %v496_v50, 0.0  ;;  %v71_v50 = vld [vmem:[%s2900_s0 + $0x190] sm:$0xff] }
 0x14a   :  { %v1041_v48 = vpop.f32.mrf.mxu1 }
 0x14b   :  { %v1042_v49 = vadd.f32 %v1811_v59, %v1041_v48 }
 0x14d   :  { %1352 = vst.msk [vmem:[%s2904_s5 + $0x38] sm:$0xff] %vm1344_vm1, %v1042_v49 }
 0x14e   :  { %v497_v51 = vpop.f32.mrf.mxu0 }
 0x14f   :  { %v498_v52 = vadd.f32 %v1731_v38, %v497_v51  ;;  %v72_v51 = vld [vmem:[%s2900_s0 + $0x198] sm:$0xff] }
 0x151   :  { %v780_v54 = vmax.f32 %v498_v52, 0.0 }
 0x152   :  { %v1044_v55 = vpop.f32.mrf.mxu1 }
 0x153   :  { %v1045_v58 = vadd.f32 %v1811_v59, %v1044_v55  ;;  %v895_v60 = vpack.c.bf16 %v780_v54, %v779_v53  ;;  %v174_v54 = vpack.c.bf16 %v72_v51, %v71_v50 }
 0x155   :  { %1353 = vst.msk [vmem:[%s2904_s5 + $0x40] sm:$0xff] %vm1344_vm1, %v1045_v58  ;;  %1083 = vmatmul.bf16.gmra.mxu1 %v895_v60 }
 0x156   :  { %v500_v62 = vpop.f32.mrf.mxu0 }
 0x157   :  { %v501_v1 = vadd.f32 %v1731_v38, %v500_v62 }
 0x159   :  { %1506 = vmatmul.msk.bf16.gmra.mxu0 %vm233_vm0, %v170_v61  ;;  %v781_v4 = vmax.f32 %v501_v1, 0.0  ;;  %v73_v1 = vld [vmem:[%s2900_s0 + $0x1a0] sm:$0xff] }
 0x15a   :  { %v1046_v63 = vpop.f32.mrf.mxu1 }
 0x15b   :  { %v1047_v0 = vadd.f32 %v1811_v59, %v1046_v63 }
 0x15d   :  { %1354 = vst.msk [vmem:[%s2904_s5 + $0x48] sm:$0xff] %vm1344_vm1, %v1047_v0 }
 0x15e   :  { %v502_v2 = vpop.f32.mrf.mxu0 }
 0x15f   :  { %v503_v3 = vadd.f32 %v1731_v38, %v502_v2  ;;  %v74_v2 = vld [vmem:[%s2900_s0 + $0x1a8] sm:$0xff] }
 0x161   :  { %v782_v5 = vmax.f32 %v503_v3, 0.0 }
 0x162   :  { %v1049_v6 = vpop.f32.mrf.mxu1 }
 0x163   :  { %v1050_v9 = vadd.f32 %v1811_v59, %v1049_v6  ;;  %v896_v10 = vpack.c.bf16 %v782_v5, %v781_v4  ;;  %v175_v5 = vpack.c.bf16 %v74_v2, %v73_v1  ;;  %v87_v1 = vld [vmem:[%s2900_s0 + $0x210] sm:$0xff]  ;;  %v88_v2 = vld [vmem:[%s2900_s0 + $0x218] sm:$0xff] }
 0x165   :  { %1355 = vst.msk [vmem:[%s2904_s5 + $0x50] sm:$0xff] %vm1344_vm1, %v1050_v9  ;;  %1088 = vmatmul.bf16.gmra.mxu1 %v896_v10 }
 0x166   :  { %v505_v12 = vpop.f32.mrf.mxu0 }
 0x167   :  { %v506_v15 = vadd.f32 %v1731_v38, %v505_v12 }
 0x169   :  { %1507 = vmatmul.msk.bf16.gmra.mxu0 %vm233_vm0, %v171_v11  ;;  %v783_v18 = vmax.f32 %v506_v15, 0.0  ;;  %v75_v15 = vld [vmem:[%s2900_s0 + $0x1b0] sm:$0xff] }
 0x16a   :  { %v1051_v13 = vpop.f32.mrf.mxu1 }
 0x16b   :  { %v1052_v14 = vadd.f32 %v1811_v59, %v1051_v13 }
 0x16d   :  { %1356 = vst.msk [vmem:[%s2904_s5 + $0x58] sm:$0xff] %vm1344_vm1, %v1052_v14 }
 0x16e   :  { %v507_v16 = vpop.f32.mrf.mxu0 }
 0x16f   :  { %v508_v17 = vadd.f32 %v1731_v38, %v507_v16  ;;  %v76_v16 = vld [vmem:[%s2900_s0 + $0x1b8] sm:$0xff] }
 0x171   :  { %v784_v19 = vmax.f32 %v508_v17, 0.0 }
 0x172   :  { %v1054_v20 = vpop.f32.mrf.mxu1 }
 0x173   :  { %v1055_v23 = vadd.f32 %v1811_v59, %v1054_v20  ;;  %v897_v24 = vpack.c.bf16 %v784_v19, %v783_v18  ;;  %v176_v19 = vpack.c.bf16 %v76_v16, %v75_v15 }
 0x175   :  { %1357 = vst.msk [vmem:[%s2904_s5 + $0x60] sm:$0xff] %vm1344_vm1, %v1055_v23  ;;  %1093 = vmatmul.bf16.gmra.mxu1 %v897_v24 }
 0x176   :  { %v510_v26 = vpop.f32.mrf.mxu0 }
 0x177   :  { %v511_v29 = vadd.f32 %v1731_v38, %v510_v26 }
 0x179   :  { %1508 = vmatmul.msk.bf16.gmra.mxu0 %vm233_vm0, %v172_v25  ;;  %v785_v32 = vmax.f32 %v511_v29, 0.0  ;;  %v77_v29 = vld [vmem:[%s2900_s0 + $0x1c0] sm:$0xff] }
 0x17a   :  { %v1056_v27 = vpop.f32.mrf.mxu1 }
 0x17b   :  { %v1057_v28 = vadd.f32 %v1811_v59, %v1056_v27 }
 0x17d   :  { %1358 = vst.msk [vmem:[%s2904_s5 + $0x68] sm:$0xff] %vm1344_vm1, %v1057_v28 }
 0x17e   :  { %v512_v30 = vpop.f32.mrf.mxu0 }
 0x17f   :  { %v513_v31 = vadd.f32 %v1731_v38, %v512_v30  ;;  %v78_v30 = vld [vmem:[%s2900_s0 + $0x1c8] sm:$0xff] }
 0x181   :  { %v786_v33 = vmax.f32 %v513_v31, 0.0 }
 0x182   :  { %v1059_v34 = vpop.f32.mrf.mxu1 }
 0x183   :  { %v1060_v37 = vadd.f32 %v1811_v59, %v1059_v34  ;;  %v898_v39 = vpack.c.bf16 %v786_v33, %v785_v32  ;;  %v177_v33 = vpack.c.bf16 %v78_v30, %v77_v29  ;;  %v85_v29 = vld [vmem:[%s2900_s0 + $0x200] sm:$0xff]  ;;  %v86_v30 = vld [vmem:[%s2900_s0 + $0x208] sm:$0xff] }
 0x185   :  { %1359 = vst.msk [vmem:[%s2904_s5 + $0x70] sm:$0xff] %vm1344_vm1, %v1060_v37  ;;  %1098 = vmatmul.bf16.gmra.mxu1 %v898_v39 }
 0x186   :  { %v515_v41 = vpop.f32.mrf.mxu0 }
 0x187   :  { %v516_v44 = vadd.f32 %v1731_v38, %v515_v41 }
 0x189   :  { %1509 = vmatmul.msk.bf16.gmra.mxu0 %vm233_vm0, %v173_v40  ;;  %v787_v47 = vmax.f32 %v516_v44, 0.0  ;;  %v79_v44 = vld [vmem:[%s2900_s0 + $0x1d0] sm:$0xff] }
 0x18a   :  { %v1061_v42 = vpop.f32.mrf.mxu1 }
 0x18b   :  { %v1062_v43 = vadd.f32 %v1811_v59, %v1061_v42 }
 0x18d   :  { %1360 = vst.msk [vmem:[%s2904_s5 + $0x78] sm:$0xff] %vm1344_vm1, %v1062_v43 }
 0x18e   :  { %v517_v45 = vpop.f32.mrf.mxu0 }
 0x18f   :  { %v518_v46 = vadd.f32 %v1731_v38, %v517_v45  ;;  %v80_v45 = vld [vmem:[%s2900_s0 + $0x1d8] sm:$0xff] }
 0x191   :  { %v788_v48 = vmax.f32 %v518_v46, 0.0 }
 0x192   :  { %v1064_v49 = vpop.f32.mrf.mxu1 }
 0x193   :  { %v1065_v52 = vadd.f32 %v1811_v59, %v1064_v49  ;;  %v899_v53 = vpack.c.bf16 %v788_v48, %v787_v47  ;;  %v178_v48 = vpack.c.bf16 %v80_v45, %v79_v44 }
 0x195   :  { %1361 = vst.msk [vmem:[%s2904_s5 + $0x80] sm:$0xff] %vm1344_vm1, %v1065_v52  ;;  %1103 = vmatmul.bf16.gmra.mxu1 %v899_v53 }
 0x196   :  { %v520_v55 = vpop.f32.mrf.mxu0 }
 0x197   :  { %v521_v58 = vadd.f32 %v1731_v38, %v520_v55 }
 0x199   :  { %1510 = vmatmul.msk.bf16.gmra.mxu0 %vm233_vm0, %v174_v54  ;;  %v789_v62 = vmax.f32 %v521_v58, 0.0  ;;  %v81_v58 = vld [vmem:[%s2900_s0 + $0x1e0] sm:$0xff] }
 0x19a   :  { %v1066_v56 = vpop.f32.mrf.mxu1 }
 0x19b   :  { %v1067_v57 = vadd.f32 %v1811_v59, %v1066_v56 }
 0x19d   :  { %1362 = vst.msk [vmem:[%s2904_s5 + $0x88] sm:$0xff] %vm1344_vm1, %v1067_v57 }
 0x19e   :  { %v522_v60 = vpop.f32.mrf.mxu0 }
 0x19f   :  { %v523_v61 = vadd.f32 %v1731_v38, %v522_v60  ;;  %v82_v60 = vld [vmem:[%s2900_s0 + $0x1e8] sm:$0xff] }
 0x1a1   :  { %v790_v63 = vmax.f32 %v523_v61, 0.0 }
 0x1a2   :  { %v1069_v0 = vpop.f32.mrf.mxu1 }
 0x1a3   :  { %v1070_v3 = vadd.f32 %v1811_v59, %v1069_v0  ;;  %v900_v4 = vpack.c.bf16 %v790_v63, %v789_v62  ;;  %v179_v63 = vpack.c.bf16 %v82_v60, %v81_v58 }
 0x1a5   :  { %1363 = vst.msk [vmem:[%s2904_s5 + $0x90] sm:$0xff] %vm1344_vm1, %v1070_v3  ;;  %1108 = vmatmul.bf16.gmra.mxu1 %v900_v4  ;;  %v182_v3 = vpack.c.bf16 %v88_v2, %v87_v1  ;;  %v95_v1 = vld [vmem:[%s2900_s0 + $0x250] sm:$0xff]  ;;  %v96_v2 = vld [vmem:[%s2900_s0 + $0x258] sm:$0xff] }
 0x1a6   :  { %v525_v6 = vpop.f32.mrf.mxu0 }
 0x1a7   :  { %v526_v9 = vadd.f32 %v1731_v38, %v525_v6  ;;  %1518 = vmatmul.msk.bf16.vlgmr.msra.gmra.mxu3 %vm233_vm0, %v182_v3  ;;  %v186_v3 = vpack.c.bf16 %v96_v2, %v95_v1 }
 0x1a9   :  { %1511 = vmatmul.msk.bf16.gmra.mxu0 %vm233_vm0, %v175_v5  ;;  %v791_v12 = vmax.f32 %v526_v9, 0.0 }
 0x1aa   :  { %v1071_v7 = vpop.f32.mrf.mxu1 }
 0x1ab   :  { %v1072_v8 = vadd.f32 %v1811_v59, %v1071_v7 }
 0x1ad   :  { %1364 = vst.msk [vmem:[%s2904_s5 + $0x98] sm:$0xff] %vm1344_vm1, %v1072_v8 }
 0x1ae   :  { %v527_v10 = vpop.f32.mrf.mxu0 }
 0x1af   :  { %v528_v11 = vadd.f32 %v1731_v38, %v527_v10 }
 0x1b1   :  { %v792_v13 = vmax.f32 %v528_v11, 0.0 }
 0x1b2   :  { %v1074_v14 = vpop.f32.mrf.mxu1 }
 0x1b3   :  { %v1075_v17 = vadd.f32 %v1811_v59, %v1074_v14  ;;  %v901_v18 = vpack.c.bf16 %v792_v13, %v791_v12  ;;  %v83_v12 = vld [vmem:[%s2900_s0 + $0x1f0] sm:$0xff]  ;;  %v84_v13 = vld [vmem:[%s2900_s0 + $0x1f8] sm:$0xff] }
 0x1b4   :  { %v180_v16 = vpack.c.bf16 %v84_v13, %v83_v12 }
 0x1b5   :  { %1365 = vst.msk [vmem:[%s2904_s5 + $0xa0] sm:$0xff] %vm1344_vm1, %v1075_v17  ;;  %1113 = vmatmul.bf16.gmra.mxu1 %v901_v18  ;;  %v89_v18 = vld [vmem:[%s2900_s0 + $0x220] sm:$0xff] }
 0x1b6   :  { %v530_v20 = vpop.f32.mrf.mxu0 }
 0x1b7   :  { %v531_v23 = vadd.f32 %v1731_v38, %v530_v20 }
 0x1b9   :  { %1512 = vmatmul.msk.bf16.gmra.mxu0 %vm233_vm0, %v176_v19  ;;  %v793_v26 = vmax.f32 %v531_v23, 0.0  ;;  %v90_v19 = vld [vmem:[%s2900_s0 + $0x228] sm:$0xff] }
 0x1ba   :  { %v1076_v21 = vpop.f32.mrf.mxu1  ;;  %v183_v20 = vpack.c.bf16 %v90_v19, %v89_v18 }
 0x1bb   :  { %v1077_v22 = vadd.f32 %v1811_v59, %v1076_v21 }
 0x1bc   :  { %1519 = vmatmul.msk.bf16.gmra.mxu3 %vm233_vm0, %v183_v20 }
 0x1bd   :  { %1366 = vst.msk [vmem:[%s2904_s5 + $0xa8] sm:$0xff] %vm1344_vm1, %v1077_v22 }
 0x1be   :  { %v532_v24 = vpop.f32.mrf.mxu0 }
 0x1bf   :  { %v533_v25 = vadd.f32 %v1731_v38, %v532_v24 }
 0x1c1   :  { %v794_v27 = vmax.f32 %v533_v25, 0.0 }
 0x1c2   :  { %v1079_v28 = vpop.f32.mrf.mxu1 }
 0x1c3   :  { %v1080_v31 = vadd.f32 %v1811_v59, %v1079_v28  ;;  %v902_v32 = vpack.c.bf16 %v794_v27, %v793_v26 }
 0x1c5   :  { %1367 = vst.msk [vmem:[%s2904_s5 + $0xb0] sm:$0xff] %vm1344_vm1, %v1080_v31  ;;  %1118 = vmatmul.bf16.gmra.mxu1 %v902_v32 }
 0x1c6   :  { %v535_v34 = vpop.f32.mrf.mxu0 }
 0x1c7   :  { %v536_v37 = vadd.f32 %v1731_v38, %v535_v34 }
 0x1c9   :  { %1513 = vmatmul.msk.bf16.gmra.mxu0 %vm233_vm0, %v177_v33  ;;  %v795_v41 = vmax.f32 %v536_v37, 0.0  ;;  %v181_v33 = vpack.c.bf16 %v86_v30, %v85_v29  ;;  %v99_v29 = vld [vmem:[%s2900_s0 + $0x270] sm:$0xff]  ;;  %v100_v30 = vld [vmem:[%s2900_s0 + $0x278] sm:$0xff] }
 0x1ca   :  { %v1081_v35 = vpop.f32.mrf.mxu1 }
 0x1cb   :  { %v1082_v36 = vadd.f32 %v1811_v59, %v1081_v35  ;;  %v91_v35 = vld [vmem:[%s2900_s0 + $0x230] sm:$0xff] }
 0x1cd   :  { %1368 = vst.msk [vmem:[%s2904_s5 + $0xb8] sm:$0xff] %vm1344_vm1, %v1082_v36  ;;  %v92_v36 = vld [vmem:[%s2900_s0 + $0x238] sm:$0xff] }
 0x1ce   :  { %v537_v39 = vpop.f32.mrf.mxu0  ;;  %v184_v37 = vpack.c.bf16 %v92_v36, %v91_v35 }
 0x1cf   :  { %v538_v40 = vadd.f32 %v1731_v38, %v537_v39 }
 0x1d0   :  { %1520 = vmatmul.msk.bf16.gmra.mxu3 %vm233_vm0, %v184_v37 }
 0x1d1   :  { %v796_v42 = vmax.f32 %v538_v40, 0.0 }
 0x1d2   :  { %v1084_v43 = vpop.f32.mrf.mxu1 }
 0x1d3   :  { %v1085_v46 = vadd.f32 %v1811_v59, %v1084_v43  ;;  %v903_v47 = vpack.c.bf16 %v796_v42, %v795_v41 }
 0x1d5   :  { %1369 = vst.msk [vmem:[%s2904_s5 + $0xc0] sm:$0xff] %vm1344_vm1, %v1085_v46  ;;  %1123 = vmatmul.bf16.gmra.mxu1 %v903_v47 }
 0x1d6   :  { %v540_v49 = vpop.f32.mrf.mxu0 }
 0x1d7   :  { %v541_v52 = vadd.f32 %v1731_v38, %v540_v49 }
 0x1d9   :  { %1514 = vmatmul.msk.bf16.gmra.mxu0 %vm233_vm0, %v178_v48  ;;  %v797_v55 = vmax.f32 %v541_v52, 0.0 }
 0x1da   :  { %v1086_v50 = vpop.f32.mrf.mxu1 }
 0x1db   :  { %v1087_v51 = vadd.f32 %v1811_v59, %v1086_v50  ;;  %v93_v50 = vld [vmem:[%s2900_s0 + $0x240] sm:$0xff] }
 0x1dd   :  { %1370 = vst.msk [vmem:[%s2904_s5 + $0xc8] sm:$0xff] %vm1344_vm1, %v1087_v51  ;;  %v94_v51 = vld [vmem:[%s2900_s0 + $0x248] sm:$0xff] }
 0x1de   :  { %v542_v53 = vpop.f32.mrf.mxu0  ;;  %v185_v52 = vpack.c.bf16 %v94_v51, %v93_v50 }
 0x1df   :  { %v543_v54 = vadd.f32 %v1731_v38, %v542_v53 }
 0x1e0   :  { %1521 = vmatmul.msk.bf16.gmra.mxu3 %vm233_vm0, %v185_v52 }
 0x1e1   :  { %v798_v56 = vmax.f32 %v543_v54, 0.0 }
 0x1e2   :  { %v1089_v57 = vpop.f32.mrf.mxu1 }
 0x1e3   :  { %v904_v61 = vpack.c.bf16 %v798_v56, %v797_v55  ;;  %v1090_v62 = vadd.f32 %v1811_v59, %v1089_v57 }
 0x1e5   :  { %1371 = vst.msk [vmem:[%s2904_s5 + $0xd0] sm:$0xff] %vm1344_vm1, %v1090_v62  ;;  %1128 = vmatmul.bf16.gmra.mxu1 %v904_v61 }
 0x1e6   :  { %v545_v0 = vpop.f32.mrf.mxu0 }
 0x1e7   :  { %v546_v6 = vadd.f32 %v1731_v38, %v545_v0 }
 0x1e9   :  { %1515 = vmatmul.msk.bf16.gmra.mxu0 %vm233_vm0, %v179_v63  ;;  %v799_v9 = vmax.f32 %v546_v6, 0.0 }
 0x1ea   :  { %v1091_v4 = vpop.f32.mrf.mxu1 }
 0x1eb   :  { %v1092_v5 = vadd.f32 %v1811_v59, %v1091_v4 }
 0x1ed   :  { %1372 = vst.msk [vmem:[%s2904_s5 + $0xd8] sm:$0xff] %vm1344_vm1, %v1092_v5 }
 0x1ee   :  { %v547_v7 = vpop.f32.mrf.mxu0 }
 0x1ef   :  { %v548_v8 = vadd.f32 %v1731_v38, %v547_v7 }
 0x1f0   :  { %1522 = vmatmul.msk.bf16.gmra.mxu3 %vm233_vm0, %v186_v3  ;;  %v2254_v3 = vld [vmem:[%s2901_s2] ss:$0 sm:$0xff] }
 0x1f1   :  { %v800_v10 = vmax.f32 %v548_v8, 0.0 }
 0x1f2   :  { %v1094_v11 = vpop.f32.mrf.mxu1 }
 0x1f3   :  { %v905_v14 = vpack.c.bf16 %v800_v10, %v799_v9  ;;  %v1095_v15 = vadd.f32 %v1811_v59, %v1094_v11 }
 0x1f5   :  { %1373 = vst.msk [vmem:[%s2904_s5 + $0xe0] sm:$0xff] %vm1344_vm1, %v1095_v15  ;;  %1133 = vmatmul.bf16.gmra.mxu1 %v905_v14  ;;  %v97_v15 = vld [vmem:[%s2900_s0 + $0x260] sm:$0xff] }
 0x1f6   :  { %v550_v17 = vpop.f32.mrf.mxu0 }
 0x1f7   :  { %v551_v23 = vadd.f32 %v1731_v38, %v550_v17 }
 0x1f9   :  { %1516 = vmatmul.msk.bf16.gmra.mxu0 %vm233_vm0, %v180_v16  ;;  %v801_v26 = vmax.f32 %v551_v23, 0.0  ;;  %v98_v16 = vld [vmem:[%s2900_s0 + $0x268] sm:$0xff] }
 0x1fa   :  { %v1096_v21 = vpop.f32.mrf.mxu1  ;;  %v187_v17 = vpack.c.bf16 %v98_v16, %v97_v15 }
 0x1fb   :  { %v1097_v22 = vadd.f32 %v1811_v59, %v1096_v21 }
 0x1fd   :  { %1374 = vst.msk [vmem:[%s2904_s5 + $0xe8] sm:$0xff] %vm1344_vm1, %v1097_v22 }
 0x1fe   :  { %v552_v24 = vpop.f32.mrf.mxu0 }
 0x1ff   :  { %v553_v25 = vadd.f32 %v1731_v38, %v552_v24 }
 0x200   :  { %1523 = vmatmul.msk.bf16.gmra.mxu3 %vm233_vm0, %v187_v17 }
 0x201   :  { %v802_v27 = vmax.f32 %v553_v25, 0.0 }
 0x202   :  { %v1099_v28 = vpop.f32.mrf.mxu1 }
 0x203   :  { %v906_v31 = vpack.c.bf16 %v802_v27, %v801_v26  ;;  %v1100_v32 = vadd.f32 %v1811_v59, %v1099_v28 }
 0x205   :  { %1375 = vst.msk [vmem:[%s2904_s5 + $0xf0] sm:$0xff] %vm1344_vm1, %v1100_v32  ;;  %1138 = vmatmul.bf16.gmra.mxu1 %v906_v31  ;;  %v188_v31 = vpack.c.bf16 %v100_v30, %v99_v29 }
 0x206   :  { %v555_v34 = vpop.f32.mrf.mxu0 }
 0x207   :  { %v556_v41 = vadd.f32 %v1731_v38, %v555_v34 }
 0x209   :  { %1517 = vmatmul.msk.bf16.gmra.mxu0 %vm233_vm0, %v181_v33  ;;  %v803_v44 = vmax.f32 %v556_v41, 0.0 }
 0x20a   :  { %v1101_v39 = vpop.f32.mrf.mxu1 }
 0x20b   :  { %v1102_v40 = vadd.f32 %v1811_v59, %v1101_v39 }
 0x20d   :  { %1376 = vst.msk [vmem:[%s2904_s5 + $0xf8] sm:$0xff] %vm1344_vm1, %v1102_v40 }
 0x20e   :  { %v557_v42 = vpop.f32.mrf.mxu0 }
 0x20f   :  { %v558_v43 = vadd.f32 %v1731_v38, %v557_v42 }
 0x210   :  { %1524 = vmatmul.msk.bf16.gmra.mxu3 %vm233_vm0, %v188_v31 }
 0x211   :  { %v804_v45 = vmax.f32 %v558_v43, 0.0 }
 0x212   :  { %v1104_v46 = vpop.f32.mrf.mxu1 }
 0x213   :  { %v907_v47 = vpack.c.bf16 %v804_v45, %v803_v44  ;;  %v1105_v48 = vadd.f32 %v1811_v59, %v1104_v46  ;;  %v101_v44 = vld [vmem:[%s2900_s0 + $0x280] sm:$0xff]  ;;  %v102_v45 = vld [vmem:[%s2900_s0 + $0x288] sm:$0xff] }
 0x214   :  { %v189_v46 = vpack.c.bf16 %v102_v45, %v101_v44  ;;  %v110_v44 = vld [vmem:[%s2900_s0 + $0x2c8] sm:$0xff] }
 0x215   :  { %1377 = vst.msk [vmem:[%s2904_s5 + $0x100] sm:$0xff] %vm1344_vm1, %v1105_v48  ;;  %1143 = vmatmul.bf16.gmra.mxu1 %v907_v47 }
 0x216   :  { %v560_v49 = vpop.f32.mrf.mxu0 }
 0x217   :  { %v561_v55 = vadd.f32 %v1731_v38, %v560_v49 }
 0x219   :  { %v805_v58 = vmax.f32 %v561_v55, 0.0 }
 0x21a   :  { %v1106_v53 = vpop.f32.mrf.mxu1 }
 0x21b   :  { %v1107_v54 = vadd.f32 %v1811_v59, %v1106_v53 }
 0x21d   :  { %1378 = vst.msk [vmem:[%s2904_s5 + $0x108] sm:$0xff] %vm1344_vm1, %v1107_v54 }
 0x21e   :  { %v562_v56 = vpop.f32.mrf.mxu0 }
 0x21f   :  { %v563_v57 = vadd.f32 %v1731_v38, %v562_v56 }
 0x220   :  { %1525 = vmatmul.msk.bf16.gmra.mxu3 %vm233_vm0, %v189_v46 }
 0x221   :  { %v806_v60 = vmax.f32 %v563_v57, 0.0 }
 0x222   :  { %v1109_v61 = vpop.f32.mrf.mxu1 }
 0x223   :  { %v908_v62 = vpack.c.bf16 %v806_v60, %v805_v58  ;;  %v1110_v63 = vadd.f32 %v1811_v59, %v1109_v61  ;;  %v103_v58 = vld [vmem:[%s2900_s0 + $0x290] sm:$0xff]  ;;  %v104_v60 = vld [vmem:[%s2900_s0 + $0x298] sm:$0xff] }
 0x224   :  { %v190_v61 = vpack.c.bf16 %v104_v60, %v103_v58  ;;  %v112_v58 = vld [vmem:[%s2900_s0 + $0x2d8] sm:$0xff] }
 0x225   :  { %1379 = vst.msk [vmem:[%s2904_s5 + $0x110] sm:$0xff] %vm1344_vm1, %v1110_v63  ;;  %1148 = vmatmul.bf16.gmra.mxu1 %v908_v62 }
 0x226   :  { %v565_v0 = vpop.f32.mrf.mxu0 }
 0x227   :  { %v566_v6 = vadd.f32 %v1731_v38, %v565_v0 }
 0x229   :  { %v807_v9 = vmax.f32 %v566_v6, 0.0 }
 0x22a   :  { %v1111_v4 = vpop.f32.mrf.mxu1  ;;  %v600_v2 = vpop.f32.mrf.mxu3 }
 0x22b   :  { %v1112_v5 = vadd.f32 %v1811_v59, %v1111_v4 }
 0x22d   :  { %1380 = vst.msk [vmem:[%s2904_s5 + $0x118] sm:$0xff] %vm1344_vm1, %v1112_v5 }
 0x22e   :  { %v567_v7 = vpop.f32.mrf.mxu0 }
 0x22f   :  { %v568_v8 = vadd.f32 %v1731_v38, %v567_v7 }
 0x230   :  { %1526 = vmatmul.msk.bf16.gmra.mxu3 %vm233_vm0, %v190_v61 }
 0x231   :  { %v808_v10 = vmax.f32 %v568_v8, 0.0 }
 0x232   :  { %v1114_v11 = vpop.f32.mrf.mxu1 }
 0x233   :  { %v909_v12 = vpack.c.bf16 %v808_v10, %v807_v9  ;;  %v1115_v13 = vadd.f32 %v1811_v59, %v1114_v11  ;;  %v602_v10 = vpop.f32.mrf.mxu3  ;;  %v105_v11 = vld [vmem:[%s2900_s0 + $0x2a0] sm:$0xff] }
 0x235   :  { %1381 = vst.msk [vmem:[%s2904_s5 + $0x120] sm:$0xff] %vm1344_vm1, %v1115_v13  ;;  %1153 = vmatmul.bf16.gmra.mxu1 %v909_v12  ;;  %v106_v12 = vld [vmem:[%s2900_s0 + $0x2a8] sm:$0xff] }
 0x236   :  { %v570_v14 = vpop.f32.mrf.mxu0  ;;  %v191_v13 = vpack.c.bf16 %v106_v12, %v105_v11 }
 0x237   :  { %v571_v20 = vadd.f32 %v1731_v38, %v570_v14 }
 0x239   :  { %v809_v23 = vmax.f32 %v571_v20, 0.0 }
 0x23a   :  { %v1116_v18 = vpop.f32.mrf.mxu1 }
 0x23b   :  { %v1117_v19 = vadd.f32 %v1811_v59, %v1116_v18 }
 0x23d   :  { %1382 = vst.msk [vmem:[%s2904_s5 + $0x128] sm:$0xff] %vm1344_vm1, %v1117_v19 }
 0x23e   :  { %v572_v21 = vpop.f32.mrf.mxu0 }
 0x23f   :  { %v573_v22 = vadd.f32 %v1731_v38, %v572_v21  ;;  %v605_v18 = vpop.f32.mrf.mxu3 }
 0x240   :  { %1527 = vmatmul.msk.bf16.gmra.mxu3 %vm233_vm0, %v191_v13 }
 0x241   :  { %v810_v24 = vmax.f32 %v573_v22, 0.0 }
 0x242   :  { %v1119_v25 = vpop.f32.mrf.mxu1 }
 0x243   :  { %v910_v26 = vpack.c.bf16 %v810_v24, %v809_v23  ;;  %v1120_v27 = vadd.f32 %v1811_v59, %v1119_v25 }
 0x245   :  { %1383 = vst.msk [vmem:[%s2904_s5 + $0x130] sm:$0xff] %vm1344_vm1, %v1120_v27  ;;  %1158 = vmatmul.bf16.gmra.mxu1 %v910_v26  ;;  %v107_v27 = vld [vmem:[%s2900_s0 + $0x2b0] sm:$0xff] }
 0x246   :  { %v575_v28 = vpop.f32.mrf.mxu0 }
 0x247   :  { %v576_v34 = vadd.f32 %v1731_v38, %v575_v28  ;;  %v607_v26 = vpop.f32.mrf.mxu3  ;;  %v108_v28 = vld [vmem:[%s2900_s0 + $0x2b8] sm:$0xff] }
 0x248   :  { %v192_v29 = vpack.c.bf16 %v108_v28, %v107_v27  ;;  %v2368_v27 = vld [vmem:[%s2903_s4] ss:$0 sm:$0xff] }
 0x249   :  { %v811_v37 = vmax.f32 %v576_v34, 0.0 }
 0x24a   :  { %v1121_v32 = vpop.f32.mrf.mxu1 }
 0x24b   :  { %v1122_v33 = vadd.f32 %v1811_v59, %v1121_v32 }
 0x24d   :  { %1384 = vst.msk [vmem:[%s2904_s5 + $0x138] sm:$0xff] %vm1344_vm1, %v1122_v33 }
 0x24e   :  { %v577_v35 = vpop.f32.mrf.mxu0 }
 0x24f   :  { %v578_v36 = vadd.f32 %v1731_v38, %v577_v35 }
 0x250   :  { %1528 = vmatmul.msk.bf16.gmra.mxu3 %vm233_vm0, %v192_v29 }
 0x251   :  { %v812_v39 = vmax.f32 %v578_v36, 0.0 }
 0x252   :  { %v1124_v40 = vpop.f32.mrf.mxu1 }
 0x253   :  { %v911_v41 = vpack.c.bf16 %v812_v39, %v811_v37  ;;  %v1125_v42 = vadd.f32 %v1811_v59, %v1124_v40  ;;  %v610_v34 = vpop.f32.mrf.mxu3 }
 0x254   :  { %v611_v12 = vadd.f32 %v2254_v3, %v610_v34 }
 0x255   :  { %1385 = vst.msk [vmem:[%s2904_s5 + $0x140] sm:$0xff] %vm1344_vm1, %v1125_v42  ;;  %1163 = vmatmul.bf16.gmra.mxu1 %v911_v41 }
 0x256   :  { %v580_v43 = vpop.f32.mrf.mxu0 }
 0x257   :  { %v581_v49 = vadd.f32 %v1731_v38, %v580_v43  ;;  %v109_v43 = vld [vmem:[%s2900_s0 + $0x2c0] sm:$0xff] }
 0x258   :  { %v193_v45 = vpack.c.bf16 %v110_v44, %v109_v43 }
 0x259   :  { %v813_v52 = vmax.f32 %v581_v49, 0.0 }
 0x25a   :  { %v1126_v47 = vpop.f32.mrf.mxu1 }
 0x25b   :  { %v1127_v48 = vadd.f32 %v1811_v59, %v1126_v47  ;;  %v612_v42 = vpop.f32.mrf.mxu3  ;;  %v601_v47 = vadd.f32 %v2254_v3, %v600_v2 }
 0x25c   :  { %v613_v13 = vadd.f32 %v2254_v3, %v612_v42 }
 0x25d   :  { %1386 = vst.msk [vmem:[%s2904_s5 + $0x148] sm:$0xff] %vm1344_vm1, %v1127_v48  ;;  %v603_v48 = vadd.f32 %v2254_v3, %v602_v10 }
 0x25e   :  { %v582_v50 = vpop.f32.mrf.mxu0 }
 0x25f   :  { %v583_v51 = vadd.f32 %v1731_v38, %v582_v50 }
 0x260   :  { %1529 = vmatmul.msk.bf16.gmra.mxu3 %vm233_vm0, %v193_v45 }
 0x261   :  { %v814_v53 = vmax.f32 %v583_v51, 0.0  ;;  %v821_v51 = vmax.f32 %v601_v47, 0.0 }
 0x262   :  { %v1129_v54 = vpop.f32.mrf.mxu1 }
 0x263   :  { %v912_v55 = vpack.c.bf16 %v814_v53, %v813_v52  ;;  %v1130_v56 = vadd.f32 %v1811_v59, %v1129_v54  ;;  %v615_v50 = vpop.f32.mrf.mxu3  ;;  %v822_v52 = vmax.f32 %v603_v48, 0.0 }
 0x265   :  { %1387 = vst.msk [vmem:[%s2904_s5 + $0x150] sm:$0xff] %vm1344_vm1, %v1130_v56  ;;  %1168 = vmatmul.bf16.gmra.mxu1 %v912_v55  ;;  %v916_v55 = vpack.c.bf16 %v822_v52, %v821_v51  ;;  %v119_v51 = vld [vmem:[%s2900_s0 + $0x310] sm:$0xff]  ;;  %v120_v52 = vld [vmem:[%s2900_s0 + $0x318] sm:$0xff] }
 0x266   :  { %v585_v57 = vpop.f32.mrf.mxu0 }
 0x267   :  { %v586_v0 = vadd.f32 %v1731_v38, %v585_v57  ;;  %v111_v57 = vld [vmem:[%s2900_s0 + $0x2d0] sm:$0xff] }
 0x268   :  { %v194_v60 = vpack.c.bf16 %v112_v58, %v111_v57 }
 0x269   :  { %v815_v5 = vmax.f32 %v586_v0, 0.0 }
 0x26a   :  { %v1131_v62 = vpop.f32.mrf.mxu1 }
 0x26b   :  { %v1132_v63 = vadd.f32 %v1811_v59, %v1131_v62  ;;  %v617_v56 = vpop.f32.mrf.mxu3  ;;  %v606_v62 = vadd.f32 %v2254_v3, %v605_v18 }
 0x26d   :  { %1388 = vst.msk [vmem:[%s2904_s5 + $0x158] sm:$0xff] %vm1344_vm1, %v1132_v63  ;;  %v608_v63 = vadd.f32 %v2254_v3, %v607_v26  ;;  %v823_v2 = vmax.f32 %v606_v62, 0.0  ;;  %v618_v26 = vadd.f32 %v2254_v3, %v617_v56 }
 0x26e   :  { %v587_v1 = vpop.f32.mrf.mxu0 }
 0x26f   :  { %v588_v4 = vadd.f32 %v2254_v3, %v587_v1 }
 0x270   :  { %1530 = vmatmul.msk.bf16.gmra.mxu3 %vm233_vm0, %v194_v60 }
 0x271   :  { %v816_v6 = vmax.f32 %v588_v4, 0.0  ;;  %v824_v4 = vmax.f32 %v608_v63, 0.0 }
 0x272   :  { %v1134_v7 = vpop.f32.mrf.mxu1 }
 0x273   :  { %v913_v8 = vpack.c.bf16 %v816_v6, %v815_v5  ;;  %v1135_v38 = vadd.f32 %v1811_v59, %v1134_v7  ;;  %v620_v1 = vpop.f32.mrf.mxu3  ;;  %v917_v7 = vpack.c.bf16 %v824_v4, %v823_v2  ;;  %v121_v2 = vld [vmem:[%s2900_s0 + $0x320] sm:$0xff]  ;;  %v122_v4 = vld [vmem:[%s2900_s0 + $0x328] sm:$0xff] }
 0x275   :  { %1389 = vst.msk [vmem:[%s2904_s5 + $0x160] sm:$0xff] %vm1344_vm1, %v1135_v38  ;;  %1173 = vmatmul.bf16.gmra.mxu1 %v913_v8  ;;  %v113_v38 = vld [vmem:[%s2900_s0 + $0x2e0] sm:$0xff] }
 0x276   :  { %v590_v9 = vpop.f32.mrf.mxu0 }
 0x277   :  { %v591_v16 = vadd.f32 %v2254_v3, %v590_v9  ;;  %v114_v9 = vld [vmem:[%s2900_s0 + $0x2e8] sm:$0xff] }
 0x278   :  { %v195_v10 = vpack.c.bf16 %v114_v9, %v113_v38 }
 0x279   :  { %v817_v20 = vmax.f32 %v591_v16, 0.0  ;;  %v825_v16 = vmax.f32 %v611_v12, 0.0 }
 0x27a   :  { %v1136_v14 = vpop.f32.mrf.mxu1 }
 0x27b   :  { %v1137_v15 = vadd.f32 %v1811_v59, %v1136_v14  ;;  %v622_v8 = vpop.f32.mrf.mxu3 }
 0x27c   :  { %v623_v42 = vadd.f32 %v2254_v3, %v622_v8 }
 0x27d   :  { %1390 = vst.msk [vmem:[%s2904_s5 + $0x168] sm:$0xff] %vm1344_vm1, %v1137_v15 }
 0x27e   :  { %v592_v17 = vpop.f32.mrf.mxu0 }
 0x27f   :  { %v593_v19 = vadd.f32 %v2254_v3, %v592_v17  ;;  %v826_v17 = vmax.f32 %v613_v13, 0.0 }
 0x280   :  { %1531 = vmatmul.msk.bf16.gmra.mxu3 %vm233_vm0, %v195_v10 }
 0x281   :  { %v818_v21 = vmax.f32 %v593_v19, 0.0 }
 0x282   :  { %v1139_v22 = vpop.f32.mrf.mxu1 }
 0x283   :  { %v914_v23 = vpack.c.bf16 %v818_v21, %v817_v20  ;;  %v1140_v24 = vadd.f32 %v1811_v59, %v1139_v22  ;;  %v625_v15 = vpop.f32.mrf.mxu3  ;;  %v918_v20 = vpack.c.bf16 %v826_v17, %v825_v16  ;;  %v115_v22 = vld [vmem:[%s2900_s0 + $0x2f0] sm:$0xff]  ;;  %v124_v17 = vld [vmem:[%s2900_s0 + $0x338] sm:$0xff] }
 0x284   :  { %v123_v16 = vld [vmem:[%s2900_s0 + $0x330] sm:$0xff] }
 0x285   :  { %1391 = vst.msk [vmem:[%s2904_s5 + $0x170] sm:$0xff] %vm1344_vm1, %v1140_v24  ;;  %1178 = vmatmul.bf16.gmra.mxu1 %v914_v23  ;;  %v116_v23 = vld [vmem:[%s2900_s0 + $0x2f8] sm:$0xff] }
 0x286   :  { %v595_v25 = vpop.f32.mrf.mxu0  ;;  %v196_v24 = vpack.c.bf16 %v116_v23, %v115_v22 }
 0x287   :  { %v596_v32 = vadd.f32 %v2254_v3, %v595_v25 }
 0x289   :  { %v819_v36 = vmax.f32 %v596_v32, 0.0 }
 0x28a   :  { %v1141_v30 = vpop.f32.mrf.mxu1 }
 0x28b   :  { %v1142_v31 = vadd.f32 %v1811_v59, %v1141_v30  ;;  %v627_v21 = vpop.f32.mrf.mxu3 }
 0x28c   :  { %v628_v56 = vadd.f32 %v2254_v3, %v627_v21 }
 0x28d   :  { %1392 = vst.msk [vmem:[%s2904_s5 + $0x178] sm:$0xff] %vm1344_vm1, %v1142_v31  ;;  %v828_v31 = vmax.f32 %v618_v26, 0.0 }
 0x28e   :  { %v597_v33 = vpop.f32.mrf.mxu0 }
 0x28f   :  { %v598_v35 = vadd.f32 %v2254_v3, %v597_v33 }
 0x290   :  { %1532 = vmatmul.msk.bf16.gmra.mxu3 %vm233_vm0, %v196_v24 }
 0x291   :  { %v820_v37 = vmax.f32 %v598_v35, 0.0 }
 0x292   :  { %v1144_v39 = vpop.f32.mrf.mxu1 }
 0x293   :  { %v1145_v40 = vadd.f32 %v1811_v59, %v1144_v39  ;;  %v915_v41 = vpack.c.bf16 %v820_v37, %v819_v36  ;;  %v630_v29 = vpop.f32.mrf.mxu3  ;;  %v117_v36 = vld [vmem:[%s2900_s0 + $0x300] sm:$0xff]  ;;  %v118_v37 = vld [vmem:[%s2900_s0 + $0x308] sm:$0xff] }
 0x294   :  { %v197_v39 = vpack.c.bf16 %v118_v37, %v117_v36 }
 0x295   :  { %1393 = vst.msk [vmem:[%s2904_s5 + $0x180] sm:$0xff] %vm1344_vm1, %v1145_v40  ;;  %1183 = vmatmul.bf16.vlgmr.msra.gmra.mxu2 %v915_v41  ;;  %v621_v41 = vadd.f32 %v2254_v3, %v620_v1 }
 0x297   :  { %v829_v45 = vmax.f32 %v621_v41, 0.0 }
 0x29a   :  { %v1146_v46 = vpop.f32.mrf.mxu1 }
 0x29b   :  { %v1147_v49 = vadd.f32 %v1811_v59, %v1146_v46  ;;  %v632_v35 = vpop.f32.mrf.mxu3  ;;  %v830_v46 = vmax.f32 %v623_v42, 0.0 }
 0x29c   :  { %v633_v8 = vadd.f32 %v2254_v3, %v632_v35 }
 0x29d   :  { %1394 = vst.msk [vmem:[%s2904_s5 + $0x188] sm:$0xff] %vm1344_vm1, %v1147_v49  ;;  %v920_v49 = vpack.c.bf16 %v830_v46, %v829_v45  ;;  %v128_v45 = vld [vmem:[%s2900_s0 + $0x358] sm:$0xff] }
 0x2a0   :  { %1533 = vmatmul.msk.bf16.gmra.mxu3 %vm233_vm0, %v197_v39 }
 0x2a2   :  { %v1149_v53 = vpop.f32.mrf.mxu1 }
 0x2a3   :  { %v1150_v54 = vadd.f32 %v1811_v59, %v1149_v53  ;;  %v635_v44 = vpop.f32.mrf.mxu3  ;;  %v198_v53 = vpack.c.bf16 %v120_v52, %v119_v51 }
 0x2a5   :  { %1395 = vst.msk [vmem:[%s2904_s5 + $0x190] sm:$0xff] %vm1344_vm1, %v1150_v54  ;;  %1188 = vmatmul.bf16.gmra.mxu2 %v916_v55  ;;  %v626_v55 = vadd.f32 %v2254_v3, %v625_v15 }
 0x2a7   :  { %v831_v60 = vmax.f32 %v626_v55, 0.0 }
 0x2aa   :  { %v1151_v61 = vpop.f32.mrf.mxu1 }
 0x2ab   :  { %v1152_v0 = vadd.f32 %v1811_v59, %v1151_v61  ;;  %v832_v61 = vmax.f32 %v628_v56, 0.0 }
 0x2ad   :  { %1396 = vst.msk [vmem:[%s2904_s5 + $0x198] sm:$0xff] %vm1344_vm1, %v1152_v0  ;;  %v921_v0 = vpack.c.bf16 %v832_v61, %v831_v60  ;;  %v130_v60 = vld [vmem:[%s2900_s0 + $0x368] sm:$0xff] }
 0x2b0   :  { %1534 = vmatmul.msk.bf16.gmra.mxu3 %vm233_vm0, %v198_v53 }
 0x2b2   :  { %v1154_v5 = vpop.f32.mrf.mxu1 }
 0x2b3   :  { %v1155_v6 = vadd.f32 %v1811_v59, %v1154_v5  ;;  %v199_v5 = vpack.c.bf16 %v122_v4, %v121_v2 }
 0x2b5   :  { %1397 = vst.msk [vmem:[%s2904_s5 + $0x1a0] sm:$0xff] %vm1344_vm1, %v1155_v6  ;;  %1193 = vmatmul.bf16.gmra.mxu2 %v917_v7  ;;  %v631_v7 = vadd.f32 %v2254_v3, %v630_v29  ;;  %v125_v29 = vld [vmem:[%s2900_s0 + $0x340] sm:$0xff] }
 0x2b7   :  { %v833_v10 = vmax.f32 %v631_v7, 0.0 }
 0x2ba   :  { %v1156_v11 = vpop.f32.mrf.mxu1 }
 0x2bb   :  { %v1157_v14 = vadd.f32 %v1811_v59, %v1156_v11  ;;  %v834_v11 = vmax.f32 %v633_v8, 0.0 }
 0x2bd   :  { %1398 = vst.msk [vmem:[%s2904_s5 + $0x1a8] sm:$0xff] %vm1344_vm1, %v1157_v14  ;;  %v922_v14 = vpack.c.bf16 %v834_v11, %v833_v10  ;;  %v132_v10 = vld [vmem:[%s2900_s0 + $0x378] sm:$0xff] }
 0x2c0   :  { %1535 = vmatmul.msk.bf16.gmra.mxu3 %vm233_vm0, %v199_v5 }
 0x2c2   :  { %v1159_v18 = vpop.f32.mrf.mxu1 }
 0x2c3   :  { %v1160_v19 = vadd.f32 %v1811_v59, %v1159_v18  ;;  %v616_v59 = vadd.f32 %v2254_v3, %v615_v50  ;;  %v637_v50 = vpop.f32.mrf.mxu3  ;;  %v200_v18 = vpack.c.bf16 %v124_v17, %v123_v16 }
 0x2c4   :  { %v638_v21 = vadd.f32 %v2254_v3, %v637_v50 }
 0x2c5   :  { %1399 = vst.msk [vmem:[%s2904_s5 + $0x1b0] sm:$0xff] %vm1344_vm1, %v1160_v19  ;;  %1198 = vmatmul.bf16.gmra.mxu2 %v918_v20  ;;  %v827_v30 = vmax.f32 %v616_v59, 0.0  ;;  %v636_v20 = vadd.f32 %v2254_v3, %v635_v44  ;;  %v127_v44 = vld [vmem:[%s2900_s0 + $0x350] sm:$0xff] }
 0x2c7   :  { %v919_v34 = vpack.c.bf16 %v828_v31, %v827_v30  ;;  %v835_v24 = vmax.f32 %v636_v20, 0.0  ;;  %v126_v30 = vld [vmem:[%s2900_s0 + $0x348] sm:$0xff] }
 0x2ca   :  { %v1161_v25 = vpop.f32.mrf.mxu1 }
 0x2cb   :  { %v1162_v28 = vadd.f32 %v2368_v27, %v1161_v25  ;;  %v640_v58 = vpop.f32.mrf.mxu3  ;;  %v836_v25 = vmax.f32 %v638_v21, 0.0 }
 0x2cd   :  { %1400 = vst.msk [vmem:[%s2904_s5 + $0x1b8] sm:$0xff] %vm1344_vm1, %v1162_v28  ;;  %v923_v59 = vpack.c.bf16 %v836_v25, %v835_v24  ;;  %v134_v24 = vld [vmem:[%s2900_s0 + $0x388] sm:$0xff] }
 0x2d0   :  { %1536 = vmatmul.msk.bf16.gmra.mxu3 %vm233_vm0, %v200_v18 }
 0x2d2   :  { %v1164_v32 = vpop.f32.mrf.mxu1 }
 0x2d3   :  { %v1165_v33 = vadd.f32 %v2368_v27, %v1164_v32  ;;  %v642_v1 = vpop.f32.mrf.mxu3  ;;  %v201_v32 = vpack.c.bf16 %v126_v30, %v125_v29 }
 0x2d5   :  { %1401 = vst.msk [vmem:[%s2904_s5 + $0x1c0] sm:$0xff] %vm1344_vm1, %v1165_v33  ;;  %1203 = vmatmul.bf16.gmra.mxu2 %v919_v34  ;;  %v641_v33 = vadd.f32 %v2254_v3, %v640_v58  ;;  %v643_v34 = vadd.f32 %v2254_v3, %v642_v1  ;;  %v129_v58 = vld [vmem:[%s2900_s0 + $0x360] sm:$0xff] }
 0x2d7   :  { %v837_v36 = vmax.f32 %v641_v33, 0.0  ;;  %v838_v37 = vmax.f32 %v643_v34, 0.0 }
 0x2d9   :  { %v924_v41 = vpack.c.bf16 %v838_v37, %v837_v36  ;;  %v135_v37 = vld [vmem:[%s2900_s0 + $0x390] sm:$0xff] }
 0x2da   :  { %v1166_v40 = vpop.f32.mrf.mxu1 }
 0x2db   :  { %v1167_v43 = vadd.f32 %v2368_v27, %v1166_v40  ;;  %v645_v9 = vpop.f32.mrf.mxu3 }
 0x2dd   :  { %1402 = vst.msk [vmem:[%s2904_s5 + $0x1c8] sm:$0xff] %vm1344_vm1, %v1167_v43 }
 0x2e0   :  { %1537 = vmatmul.msk.bf16.gmra.mxu3 %vm233_vm0, %v201_v32 }
 0x2e2   :  { %v1169_v47 = vpop.f32.mrf.mxu1 }
 0x2e3   :  { %v1170_v48 = vadd.f32 %v2368_v27, %v1169_v47  ;;  %v647_v15 = vpop.f32.mrf.mxu3  ;;  %v202_v47 = vpack.c.bf16 %v128_v45, %v127_v44 }
 0x2e5   :  { %1403 = vst.msk [vmem:[%s2904_s5 + $0x1d0] sm:$0xff] %vm1344_vm1, %v1170_v48  ;;  %1208 = vmatmul.bf16.gmra.mxu2 %v920_v49  ;;  %v646_v48 = vadd.f32 %v2254_v3, %v645_v9  ;;  %v648_v49 = vadd.f32 %v2254_v3, %v647_v15  ;;  %v131_v9 = vld [vmem:[%s2900_s0 + $0x370] sm:$0xff] }
 0x2e7   :  { %v839_v51 = vmax.f32 %v646_v48, 0.0  ;;  %v840_v52 = vmax.f32 %v648_v49, 0.0 }
 0x2e9   :  { %v925_v55 = vpack.c.bf16 %v840_v52, %v839_v51  ;;  %v137_v52 = vld [vmem:[%s2900_s0 + $0x3a0] sm:$0xff] }
 0x2ea   :  { %v1171_v54 = vpop.f32.mrf.mxu1 }
 0x2eb   :  { %v1172_v57 = vadd.f32 %v2368_v27, %v1171_v54  ;;  %v650_v23 = vpop.f32.mrf.mxu3 }
 0x2ed   :  { %1404 = vst.msk [vmem:[%s2904_s5 + $0x1d8] sm:$0xff] %vm1344_vm1, %v1172_v57 }
 0x2f0   :  { %1538 = vmatmul.msk.bf16.gmra.mxu3 %vm233_vm0, %v202_v47 }
 0x2f2   :  { %v1174_v62 = vpop.f32.mrf.mxu1 }
 0x2f3   :  { %v1175_v63 = vadd.f32 %v2368_v27, %v1174_v62  ;;  %v652_v26 = vpop.f32.mrf.mxu3  ;;  %v203_v62 = vpack.c.bf16 %v130_v60, %v129_v58 }
 0x2f5   :  { %1405 = vst.msk [vmem:[%s2904_s5 + $0x1e0] sm:$0xff] %vm1344_vm1, %v1175_v63  ;;  %1213 = vmatmul.bf16.gmra.mxu2 %v921_v0  ;;  %v651_v63 = vadd.f32 %v2254_v3, %v650_v23  ;;  %v653_v0 = vadd.f32 %v2254_v3, %v652_v26  ;;  %v133_v23 = vld [vmem:[%s2900_s0 + $0x380] sm:$0xff] }
 0x2f7   :  { %v841_v2 = vmax.f32 %v651_v63, 0.0  ;;  %v842_v4 = vmax.f32 %v653_v0, 0.0 }
 0x2f9   :  { %v926_v7 = vpack.c.bf16 %v842_v4, %v841_v2  ;;  %v139_v4 = vld [vmem:[%s2900_s0 + $0x3b0] sm:$0xff] }
 0x2fa   :  { %v1176_v6 = vpop.f32.mrf.mxu1 }
 0x2fb   :  { %v1177_v38 = vadd.f32 %v2368_v27, %v1176_v6  ;;  %v655_v35 = vpop.f32.mrf.mxu3 }
 0x2fd   :  { %1406 = vst.msk [vmem:[%s2904_s5 + $0x1e8] sm:$0xff] %vm1344_vm1, %v1177_v38 }
 0x300   :  { %1539 = vmatmul.msk.bf16.gmra.mxu3 %vm233_vm0, %v203_v62 }
 0x302   :  { %v1179_v12 = vpop.f32.mrf.mxu1 }
 0x303   :  { %v1180_v13 = vadd.f32 %v2368_v27, %v1179_v12  ;;  %v657_v42 = vpop.f32.mrf.mxu3  ;;  %v204_v12 = vpack.c.bf16 %v132_v10, %v131_v9 }
 0x305   :  { %1407 = vst.msk [vmem:[%s2904_s5 + $0x1f0] sm:$0xff] %vm1344_vm1, %v1180_v13  ;;  %1218 = vmatmul.bf16.gmra.mxu2 %v922_v14  ;;  %v656_v13 = vadd.f32 %v2254_v3, %v655_v35  ;;  %v658_v14 = vadd.f32 %v2254_v3, %v657_v42 }
 0x307   :  { %v843_v16 = vmax.f32 %v656_v13, 0.0  ;;  %v844_v17 = vmax.f32 %v658_v14, 0.0 }
 0x309   :  { %v927_v20 = vpack.c.bf16 %v844_v17, %v843_v16  ;;  %v141_v17 = vld [vmem:[%s2900_s0 + $0x3c0] sm:$0xff] }
 0x30a   :  { %v1181_v19 = vpop.f32.mrf.mxu1 }
 0x30b   :  { %v1182_v22 = vadd.f32 %v2368_v27, %v1181_v19  ;;  %v660_v50 = vpop.f32.mrf.mxu3 }
 0x30c   :  { %v661_v26 = vadd.f32 %v2254_v3, %v660_v50 }
 0x30d   :  { %1408 = vst.msk [vmem:[%s2904_s5 + $0x1f8] sm:$0xff] %vm1344_vm1, %v1182_v22 }
 0x30e   :  { %v845_v30 = vmax.f32 %v661_v26, 0.0 }
 0x310   :  { %1540 = vmatmul.msk.bf16.gmra.mxu3 %vm233_vm0, %v204_v12 }
 0x313   :  { %v662_v56 = vpop.f32.mrf.mxu3 }
 0x315   :  { %1223 = vmatmul.bf16.gmra.mxu2 %v923_v59  ;;  %v205_v59 = vpack.c.bf16 %v134_v24, %v133_v23 }
 0x318   :  { %v1184_v28 = vpop.f32.mrf.mxu2 }
 0x319   :  { %v1185_v31 = vadd.f32 %v2368_v27, %v1184_v28  ;;  %v663_v28 = vadd.f32 %v2254_v3, %v662_v56 }
 0x31b   :  { %1409 = vst.msk [vmem:[%s2904_s5 + $0x200] sm:$0xff] %vm1344_vm1, %v1185_v31  ;;  %v665_v1 = vpop.f32.mrf.mxu3  ;;  %v846_v31 = vmax.f32 %v663_v28, 0.0 }
 0x31c   :  { %v666_v42 = vadd.f32 %v2254_v3, %v665_v1 }
 0x31d   :  { %v928_v34 = vpack.c.bf16 %v846_v31, %v845_v30  ;;  %v143_v31 = vld [vmem:[%s2900_s0 + $0x3d0] sm:$0xff] }
 0x31e   :  { %v847_v45 = vmax.f32 %v666_v42, 0.0 }
 0x320   :  { %v1186_v39 = vpop.f32.mrf.mxu2  ;;  %1541 = vmatmul.msk.bf16.gmra.mxu3 %vm233_vm0, %v205_v59 }
 0x321   :  { %v1187_v40 = vadd.f32 %v2368_v27, %v1186_v39  ;;  %v136_v39 = vld [vmem:[%s2900_s0 + $0x398] sm:$0xff] }
 0x323   :  { %1410 = vst.msk [vmem:[%s2904_s5 + $0x208] sm:$0xff] %vm1344_vm1, %v1187_v40  ;;  %v667_v8 = vpop.f32.mrf.mxu3 }
 0x325   :  { %1228 = vmatmul.bf16.gmra.mxu2 %v924_v41  ;;  %v206_v41 = vpack.c.bf16 %v136_v39, %v135_v37 }
 0x328   :  { %v1189_v43 = vpop.f32.mrf.mxu2 }
 0x329   :  { %v1190_v46 = vadd.f32 %v2368_v27, %v1189_v43  ;;  %v668_v43 = vadd.f32 %v2254_v3, %v667_v8 }
 0x32b   :  { %1411 = vst.msk [vmem:[%s2904_s5 + $0x210] sm:$0xff] %vm1344_vm1, %v1190_v46  ;;  %v670_v15 = vpop.f32.mrf.mxu3  ;;  %v848_v46 = vmax.f32 %v668_v43, 0.0 }
 0x32c   :  { %v671_v56 = vadd.f32 %v2254_v3, %v670_v15 }
 0x32d   :  { %v929_v49 = vpack.c.bf16 %v848_v46, %v847_v45  ;;  %v145_v46 = vld [vmem:[%s2900_s0 + $0x3e0] sm:$0xff] }
 0x32e   :  { %v849_v60 = vmax.f32 %v671_v56, 0.0 }
 0x330   :  { %v1191_v53 = vpop.f32.mrf.mxu2  ;;  %1542 = vmatmul.msk.bf16.gmra.mxu3 %vm233_vm0, %v206_v41 }
 0x331   :  { %v1192_v54 = vadd.f32 %v2368_v27, %v1191_v53  ;;  %v138_v53 = vld [vmem:[%s2900_s0 + $0x3a8] sm:$0xff] }
 0x333   :  { %1412 = vst.msk [vmem:[%s2904_s5 + $0x218] sm:$0xff] %vm1344_vm1, %v1192_v54  ;;  %v672_v21 = vpop.f32.mrf.mxu3 }
 0x335   :  { %1233 = vmatmul.bf16.gmra.mxu2 %v925_v55  ;;  %v207_v55 = vpack.c.bf16 %v138_v53, %v137_v52 }
 0x338   :  { %v1194_v57 = vpop.f32.mrf.mxu2 }
 0x339   :  { %v1195_v61 = vadd.f32 %v2368_v27, %v1194_v57  ;;  %v673_v57 = vadd.f32 %v2254_v3, %v672_v21 }
 0x33b   :  { %1413 = vst.msk [vmem:[%s2904_s5 + $0x220] sm:$0xff] %vm1344_vm1, %v1195_v61  ;;  %v675_v29 = vpop.f32.mrf.mxu3  ;;  %v850_v61 = vmax.f32 %v673_v57, 0.0 }
 0x33c   :  { %v676_v8 = vadd.f32 %v2254_v3, %v675_v29 }
 0x33d   :  { %v930_v0 = vpack.c.bf16 %v850_v61, %v849_v60  ;;  %v147_v61 = vld [vmem:[%s2900_s0 + $0x3f0] sm:$0xff] }
 0x33e   :  { %v851_v10 = vmax.f32 %v676_v8, 0.0 }
 0x340   :  { %v1196_v5 = vpop.f32.mrf.mxu2  ;;  %1543 = vmatmul.msk.bf16.gmra.mxu3 %vm233_vm0, %v207_v55 }
 0x341   :  { %v1197_v6 = vadd.f32 %v2368_v27, %v1196_v5  ;;  %v140_v5 = vld [vmem:[%s2900_s0 + $0x3b8] sm:$0xff] }
 0x343   :  { %1414 = vst.msk [vmem:[%s2904_s5 + $0x228] sm:$0xff] %vm1344_vm1, %v1197_v6  ;;  %v677_v35 = vpop.f32.mrf.mxu3 }
 0x345   :  { %1238 = vmatmul.bf16.gmra.mxu2 %v926_v7  ;;  %v208_v7 = vpack.c.bf16 %v140_v5, %v139_v4 }
 0x348   :  { %v1199_v38 = vpop.f32.mrf.mxu2 }
 0x349   :  { %v1200_v11 = vadd.f32 %v2368_v27, %v1199_v38  ;;  %v678_v38 = vadd.f32 %v2254_v3, %v677_v35 }
 0x34b   :  { %1415 = vst.msk [vmem:[%s2904_s5 + $0x230] sm:$0xff] %vm1344_vm1, %v1200_v11  ;;  %v680_v44 = vpop.f32.mrf.mxu3  ;;  %v852_v11 = vmax.f32 %v678_v38, 0.0 }
 0x34c   :  { %v681_v21 = vadd.f32 %v2254_v3, %v680_v44 }
 0x34d   :  { %v931_v14 = vpack.c.bf16 %v852_v11, %v851_v10 }
 0x34e   :  { %v853_v24 = vmax.f32 %v681_v21, 0.0 }
 0x350   :  { %v1201_v18 = vpop.f32.mrf.mxu2  ;;  %1544 = vmatmul.msk.bf16.gmra.mxu3 %vm233_vm0, %v208_v7 }
 0x351   :  { %v1202_v19 = vadd.f32 %v2368_v27, %v1201_v18  ;;  %v142_v18 = vld [vmem:[%s2900_s0 + $0x3c8] sm:$0xff] }
 0x353   :  { %1416 = vst.msk [vmem:[%s2904_s5 + $0x238] sm:$0xff] %vm1344_vm1, %v1202_v19  ;;  %v682_v50 = vpop.f32.mrf.mxu3 }
 0x355   :  { %1243 = vmatmul.bf16.gmra.mxu2 %v927_v20  ;;  %v209_v20 = vpack.c.bf16 %v142_v18, %v141_v17 }
 0x358   :  { %v1204_v22 = vpop.f32.mrf.mxu2 }
 0x359   :  { %v1205_v25 = vadd.f32 %v2368_v27, %v1204_v22  ;;  %v683_v22 = vadd.f32 %v2254_v3, %v682_v50 }
 0x35b   :  { %1417 = vst.msk [vmem:[%s2904_s5 + $0x240] sm:$0xff] %vm1344_vm1, %v1205_v25  ;;  %v685_v58 = vpop.f32.mrf.mxu3  ;;  %v854_v25 = vmax.f32 %v683_v22, 0.0 }
 0x35c   :  { %v686_v35 = vadd.f32 %v2254_v3, %v685_v58 }
 0x35d   :  { %v932_v28 = vpack.c.bf16 %v854_v25, %v853_v24 }
 0x35e   :  { %v855_v39 = vmax.f32 %v686_v35, 0.0 }
 0x360   :  { %v1206_v32 = vpop.f32.mrf.mxu2  ;;  %1545 = vmatmul.msk.bf16.gmra.mxu3 %vm233_vm0, %v209_v20 }
 0x361   :  { %v1207_v33 = vadd.f32 %v2368_v27, %v1206_v32  ;;  %v144_v32 = vld [vmem:[%s2900_s0 + $0x3d8] sm:$0xff] }
 0x363   :  { %1418 = vst.msk [vmem:[%s2904_s5 + $0x248] sm:$0xff] %vm1344_vm1, %v1207_v33  ;;  %v687_v1 = vpop.f32.mrf.mxu3 }
 0x365   :  { %1248 = vmatmul.bf16.gmra.mxu2 %v928_v34  ;;  %v210_v34 = vpack.c.bf16 %v144_v32, %v143_v31 }
 0x368   :  { %v1209_v36 = vpop.f32.mrf.mxu2 }
 0x369   :  { %v1210_v40 = vadd.f32 %v2368_v27, %v1209_v36  ;;  %v688_v36 = vadd.f32 %v2254_v3, %v687_v1 }
 0x36b   :  { %1419 = vst.msk [vmem:[%s2904_s5 + $0x250] sm:$0xff] %vm1344_vm1, %v1210_v40  ;;  %v690_v9 = vpop.f32.mrf.mxu3  ;;  %v856_v40 = vmax.f32 %v688_v36, 0.0 }
 0x36c   :  { %v691_v50 = vadd.f32 %v2254_v3, %v690_v9 }
 0x36d   :  { %v933_v43 = vpack.c.bf16 %v856_v40, %v855_v39 }
 0x36e   :  { %v857_v53 = vmax.f32 %v691_v50, 0.0 }
 0x370   :  { %v1211_v47 = vpop.f32.mrf.mxu2  ;;  %1546 = vmatmul.msk.bf16.gmra.mxu3 %vm233_vm0, %v210_v34 }
 0x371   :  { %v1212_v48 = vadd.f32 %v2368_v27, %v1211_v47  ;;  %v146_v47 = vld [vmem:[%s2900_s0 + $0x3e8] sm:$0xff] }
 0x373   :  { %1420 = vst.msk [vmem:[%s2904_s5 + $0x258] sm:$0xff] %vm1344_vm1, %v1212_v48  ;;  %v692_v15 = vpop.f32.mrf.mxu3 }
 0x375   :  { %1253 = vmatmul.bf16.gmra.mxu2 %v929_v49  ;;  %v211_v49 = vpack.c.bf16 %v146_v47, %v145_v46 }
 0x378   :  { %v1214_v51 = vpop.f32.mrf.mxu2 }
 0x379   :  { %v1215_v54 = vadd.f32 %v2368_v27, %v1214_v51  ;;  %v693_v51 = vadd.f32 %v2254_v3, %v692_v15 }
 0x37b   :  { %1421 = vst.msk [vmem:[%s2904_s5 + $0x260] sm:$0xff] %vm1344_vm1, %v1215_v54  ;;  %v695_v23 = vpop.f32.mrf.mxu3  ;;  %v858_v54 = vmax.f32 %v693_v51, 0.0 }
 0x37c   :  { %v696_v1 = vadd.f32 %v2254_v3, %v695_v23 }
 0x37d   :  { %v934_v57 = vpack.c.bf16 %v858_v54, %v857_v53 }
 0x37e   :  { %v859_v5 = vmax.f32 %v696_v1, 0.0 }
 0x380   :  { %v1216_v62 = vpop.f32.mrf.mxu2  ;;  %1547 = vmatmul.msk.bf16.gmra.mxu3 %vm233_vm0, %v211_v49 }
 0x381   :  { %v1217_v63 = vadd.f32 %v2368_v27, %v1216_v62  ;;  %v148_v62 = vld [vmem:[%s2900_s0 + $0x3f8] sm:$0xff] }
 0x383   :  { %1422 = vst.msk [vmem:[%s2904_s5 + $0x268] sm:$0xff] %vm1344_vm1, %v1217_v63  ;;  %v697_v29 = vpop.f32.mrf.mxu3 }
 0x385   :  { %1258 = vmatmul.bf16.gmra.mxu2 %v930_v0  ;;  %v212_v0 = vpack.c.bf16 %v148_v62, %v147_v61 }
 0x388   :  { %v1219_v2 = vpop.f32.mrf.mxu2 }
 0x389   :  { %v1220_v6 = vadd.f32 %v2368_v27, %v1219_v2  ;;  %v698_v2 = vadd.f32 %v2254_v3, %v697_v29 }
 0x38b   :  { %1423 = vst.msk [vmem:[%s2904_s5 + $0x270] sm:$0xff] %vm1344_vm1, %v1220_v6  ;;  %v700_v37 = vpop.f32.mrf.mxu3  ;;  %v860_v6 = vmax.f32 %v698_v2, 0.0 }
 0x38d   :  { %v935_v38 = vpack.c.bf16 %v860_v6, %v859_v5 }
 0x390   :  { %v1221_v12 = vpop.f32.mrf.mxu2  ;;  %1548 = vmatmul.msk.bf16.gmra.mxu3 %vm233_vm0, %v212_v0 }
 0x391   :  { %v1222_v13 = vadd.f32 %v2368_v27, %v1221_v12  ;;  %v701_v12 = vadd.f32 %v2254_v3, %v700_v37 }
 0x393   :  { %1424 = vst.msk [vmem:[%s2904_s5 + $0x278] sm:$0xff] %vm1344_vm1, %v1222_v13  ;;  %v702_v44 = vpop.f32.mrf.mxu3 }
 0x394   :  { %v703_v13 = vadd.f32 %v2254_v3, %v702_v44 }
 0x395   :  { %1263 = vmatmul.bf16.gmra.mxu2 %v931_v14  ;;  %v861_v14 = vmax.f32 %v701_v12, 0.0 }
 0x396   :  { %v862_v15 = vmax.f32 %v703_v13, 0.0 }
 0x398   :  { %v1224_v16 = vpop.f32.mrf.mxu2 }
 0x399   :  { %v1225_v19 = vadd.f32 %v2368_v27, %v1224_v16 }
 0x39b   :  { %1425 = vst.msk [vmem:[%s2904_s5 + $0x280] sm:$0xff] %vm1344_vm1, %v1225_v19  ;;  %v705_v52 = vpop.f32.mrf.mxu3  ;;  %v936_v19 = vpack.c.bf16 %v862_v15, %v861_v14 }
 0x39c   :  { %v706_v22 = vadd.f32 %v2254_v3, %v705_v52 }
 0x39e   :  { %v863_v25 = vmax.f32 %v706_v22, 0.0 }
 0x3a0   :  { %v1226_v59 = vpop.f32.mrf.mxu2 }
 0x3a1   :  { %v1227_v26 = vadd.f32 %v2368_v27, %v1226_v59 }
 0x3a3   :  { %1426 = vst.msk [vmem:[%s2904_s5 + $0x288] sm:$0xff] %vm1344_vm1, %v1227_v26  ;;  %v707_v58 = vpop.f32.mrf.mxu3 }
 0x3a4   :  { %v708_v23 = vadd.f32 %v2254_v3, %v707_v58 }
 0x3a5   :  { %1268 = vmatmul.bf16.gmra.mxu2 %v932_v28 }
 0x3a6   :  { %v864_v59 = vmax.f32 %v708_v23, 0.0 }
 0x3a8   :  { %v1229_v30 = vpop.f32.mrf.mxu2  ;;  %v937_v29 = vpack.c.bf16 %v864_v59, %v863_v25 }
 0x3a9   :  { %v1230_v33 = vadd.f32 %v2368_v27, %v1229_v30 }
 0x3ab   :  { %1427 = vst.msk [vmem:[%s2904_s5 + $0x290] sm:$0xff] %vm1344_vm1, %v1230_v33  ;;  %v710_v4 = vpop.f32.mrf.mxu3 }
 0x3ac   :  { %v711_v33 = vadd.f32 %v2254_v3, %v710_v4 }
 0x3ae   :  { %v865_v35 = vmax.f32 %v711_v33, 0.0 }
 0x3b0   :  { %v1231_v41 = vpop.f32.mrf.mxu2 }
 0x3b1   :  { %v1232_v42 = vadd.f32 %v2368_v27, %v1231_v41 }
 0x3b3   :  { %1428 = vst.msk [vmem:[%s2904_s5 + $0x298] sm:$0xff] %vm1344_vm1, %v1232_v42  ;;  %v712_v10 = vpop.f32.mrf.mxu3 }
 0x3b4   :  { %v713_v34 = vadd.f32 %v2254_v3, %v712_v10 }
 0x3b5   :  { %1273 = vmatmul.bf16.gmra.mxu2 %v933_v43 }
 0x3b6   :  { %v866_v36 = vmax.f32 %v713_v34, 0.0  ;;  %v1605_v34 = vld [vmem:[%s2901_s2] ss:$0 sm:$0xff] }
 0x3b8   :  { %v1234_v45 = vpop.f32.mrf.mxu2  ;;  %v938_v41 = vpack.c.bf16 %v866_v36, %v865_v35 }
 0x3b9   :  { %v1235_v48 = vadd.f32 %v2368_v27, %v1234_v45 }
 0x3bb   :  { %1429 = vst.msk [vmem:[%s2904_s5 + $0x2a0] sm:$0xff] %vm1344_vm1, %v1235_v48  ;;  %v715_v18 = vpop.f32.mrf.mxu3 }
 0x3bc   :  { %v716_v45 = vadd.f32 %v2254_v3, %v715_v18 }
 0x3be   :  { %v867_v47 = vmax.f32 %v716_v45, 0.0 }
 0x3c0   :  { %v1236_v55 = vpop.f32.mrf.mxu2 }
 0x3c1   :  { %v1237_v56 = vadd.f32 %v2368_v27, %v1236_v55 }
 0x3c3   :  { %1430 = vst.msk [vmem:[%s2904_s5 + $0x2a8] sm:$0xff] %vm1344_vm1, %v1237_v56  ;;  %v717_v24 = vpop.f32.mrf.mxu3 }
 0x3c4   :  { %v718_v46 = vadd.f32 %v2254_v3, %v717_v24 }
 0x3c5   :  { %1278 = vmatmul.bf16.gmra.mxu2 %v934_v57 }
 0x3c6   :  { %v868_v48 = vmax.f32 %v718_v46, 0.0 }
 0x3c8   :  { %v1239_v60 = vpop.f32.mrf.mxu2  ;;  %v939_v51 = vpack.c.bf16 %v868_v48, %v867_v47 }
 0x3c9   :  { %v1240_v63 = vadd.f32 %v2368_v27, %v1239_v60 }
 0x3cb   :  { %1431 = vst.msk [vmem:[%s2904_s5 + $0x2b0] sm:$0xff] %vm1344_vm1, %v1240_v63  ;;  %v720_v30 = vpop.f32.mrf.mxu3 }
 0x3cc   :  { %v721_v55 = vadd.f32 %v2254_v3, %v720_v30 }
 0x3ce   :  { %v869_v58 = vmax.f32 %v721_v55, 0.0 }
 0x3d0   :  { %v1241_v7 = vpop.f32.mrf.mxu2 }
 0x3d1   :  { %v1242_v8 = vadd.f32 %v2368_v27, %v1241_v7 }
 0x3d3   :  { %1432 = vst.msk [vmem:[%s2904_s5 + $0x2b8] sm:$0xff] %vm1344_vm1, %v1242_v8  ;;  %v722_v39 = vpop.f32.mrf.mxu3 }
 0x3d4   :  { %v723_v56 = vadd.f32 %v2254_v3, %v722_v39 }
 0x3d5   :  { %1283 = vmatmul.bf16.gmra.mxu2 %v935_v38 }
 0x3d6   :  { %v870_v60 = vmax.f32 %v723_v56, 0.0 }
 0x3d8   :  { %v1244_v9 = vpop.f32.mrf.mxu2  ;;  %v940_v63 = vpack.c.bf16 %v870_v60, %v869_v58 }
 0x3d9   :  { %v1245_v11 = vadd.f32 %v2368_v27, %v1244_v9 }
 0x3db   :  { %1433 = vst.msk [vmem:[%s2904_s5 + $0x2c0] sm:$0xff] %vm1344_vm1, %v1245_v11  ;;  %v725_v44 = vpop.f32.mrf.mxu3 }
 0x3dc   :  { %v726_v4 = vadd.f32 %v2254_v3, %v725_v44 }
 0x3de   :  { %v871_v6 = vmax.f32 %v726_v4, 0.0 }
 0x3e0   :  { %v1246_v16 = vpop.f32.mrf.mxu2 }
 0x3e1   :  { %v1247_v17 = vadd.f32 %v2368_v27, %v1246_v16 }
 0x3e3   :  { %1434 = vst.msk [vmem:[%s2904_s5 + $0x2c8] sm:$0xff] %vm1344_vm1, %v1247_v17  ;;  %v727_v52 = vpop.f32.mrf.mxu3 }
 0x3e4   :  { %v728_v5 = vadd.f32 %v2254_v3, %v727_v52 }
 0x3e5   :  { %1288 = vmatmul.bf16.gmra.mxu2 %v936_v19 }
 0x3e6   :  { %v872_v7 = vmax.f32 %v728_v5, 0.0 }
 0x3e8   :  { %v1249_v20 = vpop.f32.mrf.mxu2  ;;  %v941_v10 = vpack.c.bf16 %v872_v7, %v871_v6 }
 0x3e9   :  { %v1250_v21 = vadd.f32 %v2368_v27, %v1249_v20 }
 0x3eb   :  { %1435 = vst.msk [vmem:[%s2904_s5 + $0x2d0] sm:$0xff] %vm1344_vm1, %v1250_v21  ;;  %v730_v57 = vpop.f32.mrf.mxu3 }
 0x3ec   :  { %v731_v13 = vadd.f32 %v2254_v3, %v730_v57 }
 0x3ee   :  { %v873_v16 = vmax.f32 %v731_v13, 0.0 }
 0x3f0   :  { %v1251_v26 = vpop.f32.mrf.mxu2 }
 0x3f1   :  { %v1252_v28 = vadd.f32 %v2368_v27, %v1251_v26 }
 0x3f3   :  { %1436 = vst.msk [vmem:[%s2904_s5 + $0x2d8] sm:$0xff] %vm1344_vm1, %v1252_v28  ;;  %v732_v1 = vpop.f32.mrf.mxu3 }
 0x3f4   :  { %v733_v14 = vadd.f32 %v2254_v3, %v732_v1 }
 0x3f5   :  { %1293 = vmatmul.bf16.gmra.mxu2 %v937_v29 }
 0x3f6   :  { %v874_v17 = vmax.f32 %v733_v14, 0.0 }
 0x3f8   :  { %v1254_v31 = vpop.f32.mrf.mxu2  ;;  %v942_v20 = vpack.c.bf16 %v874_v17, %v873_v16 }
 0x3f9   :  { %v1255_v32 = vadd.f32 %v2368_v27, %v1254_v31 }
 0x3fb   :  { %1437 = vst.msk [vmem:[%s2904_s5 + $0x2e0] sm:$0xff] %vm1344_vm1, %v1255_v32  ;;  %v735_v9 = vpop.f32.mrf.mxu3 }
 0x3fc   :  { %v736_v24 = vadd.f32 %v2254_v3, %v735_v9 }
 0x3fe   :  { %v875_v59 = vmax.f32 %v736_v24, 0.0 }
 0x400   :  { %v1256_v37 = vpop.f32.mrf.mxu2 }
 0x401   :  { %v1257_v40 = vadd.f32 %v2368_v27, %v1256_v37 }
 0x403   :  { %1438 = vst.msk [vmem:[%s2904_s5 + $0x2e8] sm:$0xff] %vm1344_vm1, %v1257_v40  ;;  %v737_v15 = vpop.f32.mrf.mxu3 }
 0x404   :  { %v738_v25 = vadd.f32 %v2254_v3, %v737_v15 }
 0x405   :  { %1298 = vmatmul.bf16.gmra.mxu2 %v938_v41 }
 0x406   :  { %v876_v26 = vmax.f32 %v738_v25, 0.0 }
 0x408   :  { %v1259_v42 = vpop.f32.mrf.mxu2  ;;  %v943_v31 = vpack.c.bf16 %v876_v26, %v875_v59 }
 0x409   :  { %v1260_v43 = vadd.f32 %v2368_v27, %v1259_v42 }
 0x40b   :  { %1439 = vst.msk [vmem:[%s2904_s5 + $0x2f0] sm:$0xff] %vm1344_vm1, %v1260_v43  ;;  %v740_v21 = vpop.f32.mrf.mxu3 }
 0x40c   :  { %v741_v35 = vadd.f32 %v1605_v34, %v740_v21 }
 0x40e   :  { %v877_v37 = vmax.f32 %v741_v35, 0.0 }
 0x410   :  { %v1261_v49 = vpop.f32.mrf.mxu2 }
 0x411   :  { %v1262_v50 = vadd.f32 %v2368_v27, %v1261_v49 }
 0x413   :  { %1440 = vst.msk [vmem:[%s2904_s5 + $0x2f8] sm:$0xff] %vm1344_vm1, %v1262_v50  ;;  %v742_v29 = vpop.f32.mrf.mxu3 }
 0x414   :  { %v743_v36 = vadd.f32 %v1605_v34, %v742_v29 }
 0x415   :  { %1303 = vmatmul.bf16.gmra.mxu2 %v939_v51 }
 0x416   :  { %v878_v39 = vmax.f32 %v743_v36, 0.0 }
 0x418   :  { %v1264_v53 = vpop.f32.mrf.mxu2  ;;  %v944_v42 = vpack.c.bf16 %v878_v39, %v877_v37 }
 0x419   :  { %v1265_v54 = vadd.f32 %v2368_v27, %v1264_v53 }
 0x41b   :  { %1441 = vst.msk [vmem:[%s2904_s5 + $0x300] sm:$0xff] %vm1344_vm1, %v1265_v54  ;;  %v745_v33 = vpop.f32.mrf.mxu3 }
 0x41c   :  { %v746_v46 = vadd.f32 %v1605_v34, %v745_v33 }
 0x41e   :  { %v879_v49 = vmax.f32 %v746_v46, 0.0 }
 0x420   :  { %v1266_v61 = vpop.f32.mrf.mxu2 }
 0x421   :  { %v1267_v62 = vadd.f32 %v2368_v27, %v1266_v61 }
 0x423   :  { %1442 = vst.msk [vmem:[%s2904_s5 + $0x308] sm:$0xff] %vm1344_vm1, %v1267_v62  ;;  %v747_v43 = vpop.f32.mrf.mxu3 }
 0x424   :  { %v748_v47 = vadd.f32 %v1605_v34, %v747_v43 }
 0x425   :  { %1308 = vmatmul.bf16.gmra.mxu2 %v940_v63 }
 0x426   :  { %v880_v50 = vmax.f32 %v748_v47, 0.0 }
 0x428   :  { %v1269_v0 = vpop.f32.mrf.mxu2  ;;  %v945_v53 = vpack.c.bf16 %v880_v50, %v879_v49 }
 0x429   :  { %v1270_v2 = vadd.f32 %v2368_v27, %v1269_v0 }
 0x42b   :  { %1443 = vst.msk [vmem:[%s2904_s5 + $0x310] sm:$0xff] %vm1344_vm1, %v1270_v2  ;;  %v750_v48 = vpop.f32.mrf.mxu3 }
 0x42c   :  { %v751_v57 = vadd.f32 %v1605_v34, %v750_v48 }
 0x42e   :  { %v881_v60 = vmax.f32 %v751_v57, 0.0 }
 0x430   :  { %v1271_v8 = vpop.f32.mrf.mxu2 }
 0x431   :  { %v1272_v38 = vadd.f32 %v2368_v27, %v1271_v8 }
 0x433   :  { %1444 = vst.msk [vmem:[%s2904_s5 + $0x318] sm:$0xff] %vm1344_vm1, %v1272_v38  ;;  %v752_v54 = vpop.f32.mrf.mxu3 }
 0x434   :  { %v753_v58 = vadd.f32 %v1605_v34, %v752_v54 }
 0x435   :  { %1313 = vmatmul.bf16.gmra.mxu2 %v941_v10 }
 0x436   :  { %v882_v61 = vmax.f32 %v753_v58, 0.0 }
 0x438   :  { %v1274_v11 = vpop.f32.mrf.mxu2  ;;  %v946_v0 = vpack.c.bf16 %v882_v61, %v881_v60 }
 0x439   :  { %v1275_v12 = vadd.f32 %v2368_v27, %v1274_v11 }
 0x43b   :  { %1445 = vst.msk [vmem:[%s2904_s5 + $0x320] sm:$0xff] %vm1344_vm1, %v1275_v12 }
 0x440   :  { %v1276_v18 = vpop.f32.mrf.mxu2 }
 0x441   :  { %v1277_v19 = vadd.f32 %v2368_v27, %v1276_v18 }
 0x443   :  { %1446 = vst.msk [vmem:[%s2904_s5 + $0x328] sm:$0xff] %vm1344_vm1, %v1277_v19 }
 0x445   :  { %1318 = vmatmul.bf16.gmra.mxu2 %v942_v20 }
 0x448   :  { %v1279_v22 = vpop.f32.mrf.mxu2 }
 0x449   :  { %v1280_v23 = vadd.f32 %v2368_v27, %v1279_v22 }
 0x44b   :  { %1447 = vst.msk [vmem:[%s2904_s5 + $0x330] sm:$0xff] %vm1344_vm1, %v1280_v23 }
 0x450   :  { %v1281_v28 = vpop.f32.mrf.mxu2 }
 0x451   :  { %v1282_v30 = vadd.f32 %v2368_v27, %v1281_v28 }
 0x453   :  { %1448 = vst.msk [vmem:[%s2904_s5 + $0x338] sm:$0xff] %vm1344_vm1, %v1282_v30 }
 0x455   :  { %1323 = vmatmul.bf16.gmra.mxu2 %v943_v31 }
 0x458   :  { %v1284_v32 = vpop.f32.mrf.mxu2 }
 0x459   :  { %v1285_v3 = vadd.f32 %v2368_v27, %v1284_v32 }
 0x45b   :  { %1449 = vst.msk [vmem:[%s2904_s5 + $0x340] sm:$0xff] %vm1344_vm1, %v1285_v3 }
 0x460   :  { %v1286_v40 = vpop.f32.mrf.mxu2 }
 0x461   :  { %v1287_v41 = vadd.f32 %v2368_v27, %v1286_v40 }
 0x463   :  { %1450 = vst.msk [vmem:[%s2904_s5 + $0x348] sm:$0xff] %vm1344_vm1, %v1287_v41 }
 0x465   :  { %1328 = vmatmul.bf16.gmra.mxu2 %v944_v42 }
 0x468   :  { %v1289_v44 = vpop.f32.mrf.mxu2 }
 0x469   :  { %v1290_v45 = vadd.f32 %v2368_v27, %v1289_v44 }
 0x46b   :  { %1451 = vst.msk [vmem:[%s2904_s5 + $0x350] sm:$0xff] %vm1344_vm1, %v1290_v45 }
 0x470   :  { %v1291_v51 = vpop.f32.mrf.mxu2 }
 0x471   :  { %v1292_v52 = vadd.f32 %v2368_v27, %v1291_v51 }
 0x473   :  { %1452 = vst.msk [vmem:[%s2904_s5 + $0x358] sm:$0xff] %vm1344_vm1, %v1292_v52 }
 0x475   :  { %1333 = vmatmul.bf16.gmra.mxu2 %v945_v53 }
 0x478   :  { %v1294_v55 = vpop.f32.mrf.mxu2 }
 0x479   :  { %v1295_v56 = vadd.f32 %v2368_v27, %v1294_v55 }
 0x47b   :  { %1453 = vst.msk [vmem:[%s2904_s5 + $0x360] sm:$0xff] %vm1344_vm1, %v1295_v56 }
 0x480   :  { %v1296_v62 = vpop.f32.mrf.mxu2 }
 0x481   :  { %v1297_v63 = vadd.f32 %v2368_v27, %v1296_v62 }
 0x483   :  { %1454 = vst.msk [vmem:[%s2904_s5 + $0x368] sm:$0xff] %vm1344_vm1, %v1297_v63 }
 0x485   :  { %1338 = vmatmul.bf16.gmra.mxu2 %v946_v0 }
 0x488   :  { %v1299_v1 = vpop.f32.mrf.mxu2 }
 0x489   :  { %v1300_v2 = vadd.f32 %v2368_v27, %v1299_v1 }
 0x48b   :  { %1455 = vst.msk [vmem:[%s2904_s5 + $0x370] sm:$0xff] %vm1344_vm1, %v1300_v2 }
 0x490   :  { %v1301_v4 = vpop.f32.mrf.mxu2 }
 0x491   :  { %v1302_v5 = vadd.f32 %v2368_v27, %v1301_v4 }
 0x493   :  { %1456 = vst.msk [vmem:[%s2904_s5 + $0x378] sm:$0xff] %vm1344_vm1, %v1302_v5 }
 0x498   :  { %v1304_v6 = vpop.f32.mrf.mxu2 }
 0x499   :  { %v1305_v7 = vadd.f32 %v2368_v27, %v1304_v6 }
 0x49b   :  { %1457 = vst.msk [vmem:[%s2904_s5 + $0x380] sm:$0xff] %vm1344_vm1, %v1305_v7 }
 0x4a0   :  { %v1306_v8 = vpop.f32.mrf.mxu2 }
 0x4a1   :  { %v1307_v38 = vadd.f32 %v2368_v27, %v1306_v8 }
 0x4a3   :  { %1458 = vst.msk [vmem:[%s2904_s5 + $0x388] sm:$0xff] %vm1344_vm1, %v1307_v38 }
 0x4a8   :  { %v1309_v9 = vpop.f32.mrf.mxu2 }
 0x4a9   :  { %v1310_v10 = vadd.f32 %v2368_v27, %v1309_v9 }
 0x4ab   :  { %1459 = vst.msk [vmem:[%s2904_s5 + $0x390] sm:$0xff] %vm1344_vm1, %v1310_v10 }
 0x4b0   :  { %v1311_v11 = vpop.f32.mrf.mxu2 }
 0x4b1   :  { %v1312_v12 = vadd.f32 %v2368_v27, %v1311_v11 }
 0x4b3   :  { %1460 = vst.msk [vmem:[%s2904_s5 + $0x398] sm:$0xff] %vm1344_vm1, %v1312_v12 }
 0x4b8   :  { %v1314_v13 = vpop.f32.mrf.mxu2 }
 0x4b9   :  { %v1315_v14 = vadd.f32 %v2368_v27, %v1314_v13 }
 0x4bb   :  { %1461 = vst.msk [vmem:[%s2904_s5 + $0x3a0] sm:$0xff] %vm1344_vm1, %v1315_v14 }
 0x4c0   :  { %v1316_v15 = vpop.f32.mrf.mxu2 }
 0x4c1   :  { %v1317_v16 = vadd.f32 %v2368_v27, %v1316_v15 }
 0x4c3   :  { %1462 = vst.msk [vmem:[%s2904_s5 + $0x3a8] sm:$0xff] %vm1344_vm1, %v1317_v16 }
 0x4c8   :  { %v1319_v17 = vpop.f32.mrf.mxu2 }
 0x4c9   :  { %v1320_v18 = vadd.f32 %v2368_v27, %v1319_v17 }
 0x4cb   :  { %1463 = vst.msk [vmem:[%s2904_s5 + $0x3b0] sm:$0xff] %vm1344_vm1, %v1320_v18 }
 0x4d0   :  { %v1321_v19 = vpop.f32.mrf.mxu2 }
 0x4d1   :  { %v1322_v20 = vadd.f32 %v2368_v27, %v1321_v19 }
 0x4d3   :  { %1464 = vst.msk [vmem:[%s2904_s5 + $0x3b8] sm:$0xff] %vm1344_vm1, %v1322_v20 }
 0x4d8   :  { %v1324_v21 = vpop.f32.mrf.mxu2 }
 0x4d9   :  { %v1325_v22 = vadd.f32 %v2368_v27, %v1324_v21 }
 0x4db   :  { %1465 = vst.msk [vmem:[%s2904_s5 + $0x3c0] sm:$0xff] %vm1344_vm1, %v1325_v22 }
 0x4e0   :  { %v1326_v23 = vpop.f32.mrf.mxu2 }
 0x4e1   :  { %v1327_v24 = vadd.f32 %v2368_v27, %v1326_v23 }
 0x4e3   :  { %1466 = vst.msk [vmem:[%s2904_s5 + $0x3c8] sm:$0xff] %vm1344_vm1, %v1327_v24 }
 0x4e8   :  { %v1329_v25 = vpop.f32.mrf.mxu2 }
 0x4e9   :  { %v1330_v59 = vadd.f32 %v2368_v27, %v1329_v25 }
 0x4eb   :  { %1467 = vst.msk [vmem:[%s2904_s5 + $0x3d0] sm:$0xff] %vm1344_vm1, %v1330_v59 }
 0x4f0   :  { %v1331_v26 = vpop.f32.mrf.mxu2 }
 0x4f1   :  { %v1332_v28 = vadd.f32 %v2368_v27, %v1331_v26 }
 0x4f3   :  { %1468 = vst.msk [vmem:[%s2904_s5 + $0x3d8] sm:$0xff] %vm1344_vm1, %v1332_v28 }
 0x4f8   :  { %v1334_v29 = vpop.f32.mrf.mxu2 }
 0x4f9   :  { %v1335_v30 = vadd.f32 %v2368_v27, %v1334_v29 }
 0x4fb   :  { %1469 = vst.msk [vmem:[%s2904_s5 + $0x3e0] sm:$0xff] %vm1344_vm1, %v1335_v30 }
 0x500   :  { %v1336_v31 = vpop.f32.mrf.mxu2 }
 0x501   :  { %v1337_v32 = vadd.f32 %v2368_v27, %v1336_v31 }
 0x503   :  { %1470 = vst.msk [vmem:[%s2904_s5 + $0x3e8] sm:$0xff] %vm1344_vm1, %v1337_v32 }
 0x508   :  { %v1339_v3 = vpop.f32.mrf.mxu2 }
 0x509   :  { %v1340_v33 = vadd.f32 %v2368_v27, %v1339_v3 }
 0x50b   :  { %1471 = vst.msk [vmem:[%s2904_s5 + $0x3f0] sm:$0xff] %vm1344_vm1, %v1340_v33 }
 0x510   :  { %v1341_v34 = vpop.f32.mrf.mxu2 }
 0x511   :  { %v1342_v35 = vadd.f32 %v2368_v27, %v1341_v34 }
 0x513   :  { %1472 = vst.msk [vmem:[%s2904_s5 + $0x3f8] sm:$0xff] %vm1344_vm1, %v1342_v35 }

</bundles_post_ra>
